<compile_context>
chip_gen: v6e
topology: v6e:2x2x1
jax: 0.10.0
libtpu: 0.0.40
codegen_flags: <defaults>
</compile_context>

<pallas_src>
import jax
import jax.numpy as jnp
from jax import lax
from jax.experimental import pallas as pl
from jax.experimental.pallas import tpu as pltpu

DROPOUT_P = 0.6
KEEP_PROB = 1.0 - DROPOUT_P
NORM_SCALE = 1.0
PAIRNORM_EPS = 1e-6
LANE = 128  # lane-dense feature padding target


def _round_up(n, m):
    return (n + m - 1) // m * m


def _pick_tile(n_pad, target):
    """Largest multiple of 128 <= target that divides n_pad (n_pad is a multiple of 128)."""
    t = max(LANE, (min(target, n_pad) // LANE) * LANE)
    while n_pad % t:
        t -= LANE
    return t


def graphsage_norm_kernel(a_ref, xs_ref, xr_ref, invdeg_ref, wl_ref, wr_ref,
                          b_ref, cm_ref, out_ref, acc_ref):
    k = pl.program_id(1)

    @pl.when(k == 0)
    def _init():
        acc_ref[...] = jnp.zeros_like(acc_ref)

    # --- SAGEConv sum-aggregation: (TM, TK) bf16 binary adjacency tile @ (TK, F_pad) bf16
    #     dropped features, accumulated in f32 VMEM scratch (bf16 MXU path). ---
    acc_ref[...] += jnp.dot(a_ref[...], xs_ref[...],
                            preferred_element_type=jnp.float32)

    @pl.when(k == pl.num_programs(1) - 1)
    def _finalize():
        # mean aggregation: per-dst-row 1/deg scale in f32 (exact; never baked into bf16 A)
        agg = acc_ref[...] * invdeg_ref[...]                              # (TM, F_pad)

        # fused SAGEConv linears: two K=F_pad MXU matmuls, no VMEM concat round-trip
        h = (jnp.dot(agg, wl_ref[...], preferred_element_type=jnp.float32)
             + jnp.dot(xr_ref[...], wr_ref[...], preferred_element_type=jnp.float32)
             + b_ref[...])                                                # (TM, F_pad)

        # PairNorm 'PN-SI', scale=1: subtract the precomputed global column mean,
        # per-row rescale via rsqrt (EUP); all f32 pointwise.
        hc = h - cm_ref[...]
        inv_rownorm = lax.rsqrt(PAIRNORM_EPS +
                                jnp.sum(hc * hc, axis=1, keepdims=True))  # (TM, 1)

        # ReLU
        out_ref[...] = jnp.maximum(hc * (NORM_SCALE * inv_rownorm), 0.0)


def graphsage_norm_forward(x, adj, mask, w_l, b_l, w_r, *, tm=512, tk=1024):
    """tm/tk default to large tiles (still only a few MiB at F_pad=128, safe on v7x's
    64 MiB VMEM with double buffering); sweep per generation for big graphs."""
    N, F = x.shape
    f_pad = _round_up(max(F, LANE), LANE)
    n_pad = _round_up(N, LANE)
    tm = _pick_tile(n_pad, tm)
    tk = _pick_tile(n_pad, tk)
    grid = (n_pad // tm, n_pad // tk)
    f32 = jnp.float32

    # --- dropout (training=True), applied here (O(N*F)) so the column mean below is exact
    #     and so the kernel streams a single dropped-feature array instead of x + mask. ---
    x_drop = x.astype(f32) * mask.astype(f32) * (1.0 / KEEP_PROB)          # (N, F)

    # --- adjacency preprocessing: binarize + transpose to [dst, src] in ONE fused pass.
    #     Kept exactly 0/1 so the bf16 stream into the kernel is lossless. ---
    # TODO(synk): fold this pass into the kernel (swapped (k, i) index_map on raw adj +
    #             transposed-contraction dot_general) to drop one more O(N^2) HBM pass.
    a_bt_bool = (adj.T != 0)                                               # (N, N) [dst, src]
    a_bt_f32 = a_bt_bool.astype(f32)
    deg = jnp.sum(a_bt_f32, axis=1, keepdims=True)                         # in-degree (N, 1)
    inv_deg = 1.0 / jnp.maximum(deg, 1.0)

    # --- PairNorm column mean, hoisted algebraically (O(N*F) matvec; avoids a cross-tile
    #     reduction over h inside the kernel):
    #     mean_i h_i = ((1/N) inv_deg^T A_bin^T) @ x_drop @ W_l + mean(x_drop) @ W_r + b ---
    u = (inv_deg.reshape(1, N) @ a_bt_f32) / N                             # (1, N)
    col_mean = ((u @ x_drop) @ w_l
                + jnp.mean(x_drop, axis=0, keepdims=True) @ w_r
                + b_l)                                                     # (1, F)

    # --- zero-pad to lane-/tile-dense shapes (exactness-preserving for real rows/cols) ---
    a_bt = jnp.pad(a_bt_bool, ((0, n_pad - N), (0, n_pad - N))).astype(jnp.bfloat16)
    x_pad = jnp.pad(x_drop, ((0, n_pad - N), (0, f_pad - F)))
    xs_bf16 = x_pad.astype(jnp.bfloat16)                 # src stream (MXU lhs), bf16
    xr_f32 = x_pad                                       # root/dst stream, f32
    invdeg_pad = jnp.pad(inv_deg, ((0, n_pad - N), (0, 0)))
    wl_pad = jnp.zeros((f_pad, f_pad), f32).at[:F, :F].set(w_l)
    wr_pad = jnp.zeros((f_pad, f_pad), f32).at[:F, :F].set(w_r)
    b_pad = jnp.zeros((1, f_pad), f32).at[:, :F].set(b_l)
    cm_pad = jnp.zeros((1, f_pad), f32).at[:, :F].set(col_mean)

    # explicit VMEM budget: 2x-buffered streamed tiles + accumulator + weights + headroom
    vmem_bytes = (2 * (tm * tk * 2 + tk * f_pad * 2 + 2 * tm * f_pad * 4 + tm * 4)
                  + tm * f_pad * 4
                  + 2 * 2 * f_pad * f_pad * 4
                  + (2 << 20))
    vmem_limit = int(min(max(vmem_bytes, 16 << 20), 48 << 20))

    cost = pl.CostEstimate(
        flops=2 * n_pad * n_pad * f_pad + 4 * n_pad * f_pad * f_pad,
        transcendentals=n_pad,
        bytes_accessed=(n_pad * n_pad * 2                 # bf16 binary adjacency
                        + grid[0] * n_pad * f_pad * 2     # re-streamed bf16 src features
                        + 2 * n_pad * f_pad * 4),         # root features + output
    )

    out_pad = pl.pallas_call(
        graphsage_norm_kernel,
        out_shape=jax.ShapeDtypeStruct((n_pad, f_pad), f32),
        grid_spec=pltpu.PrefetchScalarGridSpec(
            num_scalar_prefetch=0,
            grid=grid,
            in_specs=[
                pl.BlockSpec((tm, tk), lambda i, k: (i, k)),         # A_bin^T tile (bf16)
                pl.BlockSpec((tk, f_pad), lambda i, k: (k, 0)),      # x_drop src tile (bf16)
                pl.BlockSpec((tm, f_pad), lambda i, k: (i, 0)),      # x_drop root tile (f32)
                pl.BlockSpec((tm, 1), lambda i, k: (i, 0)),          # 1/deg per dst row
                pl.BlockSpec((f_pad, f_pad), lambda i, k: (0, 0)),   # W_l
                pl.BlockSpec((f_pad, f_pad), lambda i, k: (0, 0)),   # W_r
                pl.BlockSpec((1, f_pad), lambda i, k: (0, 0)),       # b_l
                pl.BlockSpec((1, f_pad), lambda i, k: (0, 0)),       # global column mean
            ],
            out_specs=pl.BlockSpec((tm, f_pad), lambda i, k: (i, 0)),
            scratch_shapes=[pltpu.VMEM((tm, f_pad), f32)],
        ),
        compiler_params=pltpu.CompilerParams(
            dimension_semantics=("parallel", "arbitrary"),
            vmem_limit_bytes=vmem_limit,
        ),
        cost_estimate=cost,
    )(a_bt, xs_bf16, xr_f32, invdeg_pad, wl_pad, wr_pad, b_pad, cm_pad)

    return out_pad[:N, :F], adj


if __name__ == "__main__":
    N = 320      # number of nodes (pads to 384 -> 3x3 grid with tm=tk=128 below)
    NHID = 32    # hidden feature dim (SAGEConv is nhid -> nhid)

    key = jax.random.PRNGKey(0)
    k_x, k_adj, k_mask, k_wl, k_bl, k_wr = jax.random.split(key, 6)

    # Deterministic inputs
    x = jax.random.normal(k_x, (N, NHID), dtype=jnp.float32)
    adj = (jax.random.uniform(k_adj, (N, N)) < 0.05).astype(jnp.float32)

    # Dropout mask (JAX RNG; exact PyTorch RNG stream is not reproducible)
    mask = jax.random.bernoulli(k_mask, p=KEEP_PROB, shape=(N, NHID)).astype(jnp.float32)

    # Deterministic SAGEConv parameters (stored pre-transposed: y = x @ W + b)
    scale = 1.0 / jnp.sqrt(jnp.float32(NHID))
    w_l = jax.random.uniform(k_wl, (NHID, NHID), minval=-scale, maxval=scale, dtype=jnp.float32)
    b_l = jax.random.uniform(k_bl, (1, NHID), minval=-scale, maxval=scale, dtype=jnp.float32)
    w_r = jax.random.uniform(k_wr, (NHID, NHID), minval=-scale, maxval=scale, dtype=jnp.float32)

    # small tiles here so the demo exercises the multi-tile grid + K accumulation path
    out, adj_out = graphsage_norm_forward(x, adj, mask, w_l, b_l, w_r, tm=128, tk=128)
    jax.block_until_ready((out, adj_out))

    # pure-JAX reference (same mask, same original-PairNorm-repo 'PN-SI' formulation)
    def reference(x, adj, mask, w_l, b_l, w_r):
        x_d = x * mask / KEEP_PROB
        a_bt = (adj.T != 0).astype(jnp.float32)
        deg = jnp.sum(a_bt, axis=1, keepdims=True)
        agg = (a_bt @ x_d) / jnp.maximum(deg, 1.0)
        h = agg @ w_l + x_d @ w_r + b_l
        hc = h - jnp.mean(h, axis=0, keepdims=True)
        inv = lax.rsqrt(PAIRNORM_EPS + jnp.sum(hc * hc, axis=1, keepdims=True))
        return jnp.maximum(hc * (NORM_SCALE * inv), 0.0)

    ref = reference(x, adj, mask, w_l, b_l, w_r)
    max_err = float(jnp.max(jnp.abs(out - ref)))
    assert max_err < 5e-2, f"kernel/reference mismatch: max abs err = {max_err}"
    print("KERNEL_OK")
</pallas_src>

<mosaic_0001>
module attributes {stable_mosaic.version = 11 : i64} {
  func.func @graphsage_norm_kernel(%arg0: i32, %arg1: i32, %arg2: memref<128x128xbf16, #tpu.memory_space<vmem>>, %arg3: memref<128x128xbf16, #tpu.memory_space<vmem>>, %arg4: memref<128x128xf32, #tpu.memory_space<vmem>>, %arg5: memref<128x1xf32, #tpu.memory_space<vmem>>, %arg6: memref<128x128xf32, #tpu.memory_space<vmem>>, %arg7: memref<128x128xf32, #tpu.memory_space<vmem>>, %arg8: memref<1x128xf32, #tpu.memory_space<vmem>>, %arg9: memref<1x128xf32, #tpu.memory_space<vmem>>, %arg10: memref<128x128xf32, #tpu.memory_space<vmem>>, %arg11: memref<128x128xf32, #tpu.memory_space<vmem>>) attributes {dimension_semantics = [#tpu.dimension_semantics<parallel>, #tpu.dimension_semantics<arbitrary>], iteration_bounds = array<i64: 3, 3>, scalar_prefetch = 0 : i64, scratch_operands = 1 : i64, tpu.core_type = #tpu.core_type<tc>, window_params = [{transform_indices = @transform_0, window_bounds = array<i64: 128, 128>}, {transform_indices = @transform_1, window_bounds = array<i64: 128, 128>}, {transform_indices = @transform_2, window_bounds = array<i64: 128, 128>}, {transform_indices = @transform_3, window_bounds = array<i64: 128, 1>}, {pipeline_mode = #tpu.pipeline_mode<synchronous>, transform_indices = @transform_4, window_bounds = array<i64: 128, 128>}, {pipeline_mode = #tpu.pipeline_mode<synchronous>, transform_indices = @transform_5, window_bounds = array<i64: 128, 128>}, {pipeline_mode = #tpu.pipeline_mode<synchronous>, transform_indices = @transform_6, window_bounds = array<i64: 1, 128>}, {pipeline_mode = #tpu.pipeline_mode<synchronous>, transform_indices = @transform_7, window_bounds = array<i64: 1, 128>}, {transform_indices = @transform_8, window_bounds = array<i64: 128, 128>}]} {
    %c0_i32 = arith.constant 0 : i32
    %0 = arith.cmpi eq, %arg1, %c0_i32 : i32
    %1 = arith.extui %0 : i1 to i32
    %c0_i32_0 = arith.constant 0 : i32
    %2 = arith.cmpi ne, %1, %c0_i32_0 : i32
    scf.if %2 {
      %cst_9 = arith.constant 0.000000e+00 : f32
      %12 = vector.broadcast %cst_9 : f32 to vector<128x128xf32>
      %c0_10 = arith.constant 0 : index
      %c0_11 = arith.constant 0 : index
      %13 = vector.load %arg11[%c0_10, %c0_11] : memref<128x128xf32, #tpu.memory_space<vmem>>, vector<128x128xf32>
      tpu.vector_store %arg11[%c0_10, %c0_11], %12 {strides = array<i32>} : memref<128x128xf32, #tpu.memory_space<vmem>>, vector<128x128xf32>,
    } else {
    }
    %c0 = arith.constant 0 : index
    %c0_1 = arith.constant 0 : index
    %3 = vector.load %arg11[%c0, %c0_1] : memref<128x128xf32, #tpu.memory_space<vmem>>, vector<128x128xf32>
    %c0_2 = arith.constant 0 : index
    %c0_3 = arith.constant 0 : index
    %4 = vector.load %arg2[%c0_2, %c0_3] : memref<128x128xbf16, #tpu.memory_space<vmem>>, vector<128x128xbf16>
    %c0_4 = arith.constant 0 : index
    %c0_5 = arith.constant 0 : index
    %5 = vector.load %arg3[%c0_4, %c0_5] : memref<128x128xbf16, #tpu.memory_space<vmem>>, vector<128x128xbf16>
    %cst = arith.constant dense<0.000000e+00> : vector<128x128xf32>
    %6 = tpu.matmul %4, %5, %cst {dimension_numbers = #tpu.dot_dimension_numbers<[1], [0], [0], [1], [0, 0, 1, 1], [], []>} : vector<128x128xbf16>, vector<128x128xbf16>, vector<128x128xf32> -> vector<128x128xf32>
    %7 = arith.addf %3, %6 : vector<128x128xf32>
    %c0_6 = arith.constant 0 : index
    %c0_7 = arith.constant 0 : index
    %8 = vector.load %arg11[%c0_6, %c0_7] : memref<128x128xf32, #tpu.memory_space<vmem>>, vector<128x128xf32>
    tpu.vector_store %arg11[%c0_6, %c0_7], %7 {strides = array<i32>} : memref<128x128xf32, #tpu.memory_space<vmem>>, vector<128x128xf32>,
    %c2_i32 = arith.constant 2 : i32
    %9 = arith.cmpi eq, %arg1, %c2_i32 : i32
    %10 = arith.extui %9 : i1 to i32
    %c0_i32_8 = arith.constant 0 : i32
    %11 = arith.cmpi ne, %10, %c0_i32_8 : i32
    scf.if %11 {
      %c0_9 = arith.constant 0 : index
      %c0_10 = arith.constant 0 : index
      %12 = vector.load %arg11[%c0_9, %c0_10] : memref<128x128xf32, #tpu.memory_space<vmem>>, vector<128x128xf32>
      %c0_11 = arith.constant 0 : index
      %c0_12 = arith.constant 0 : index
      %13 = vector.load %arg5[%c0_11, %c0_12] : memref<128x1xf32, #tpu.memory_space<vmem>>, vector<128x1xf32>
      %14 = vector.broadcast %13 : vector<128x1xf32> to vector<128x128xf32>
      %15 = arith.mulf %12, %14 : vector<128x128xf32>
      %c0_13 = arith.constant 0 : index
      %c0_14 = arith.constant 0 : index
      %16 = vector.load %arg6[%c0_13, %c0_14] : memref<128x128xf32, #tpu.memory_space<vmem>>, vector<128x128xf32>
      %cst_15 = arith.constant dense<0.000000e+00> : vector<128x128xf32>
      %17 = tpu.matmul %15, %16, %cst_15 {dimension_numbers = #tpu.dot_dimension_numbers<[1], [0], [0], [1], [0, 0, 1, 1], [], []>} : vector<128x128xf32>, vector<128x128xf32>, vector<128x128xf32> -> vector<128x128xf32>
      %c0_16 = arith.constant 0 : index
      %c0_17 = arith.constant 0 : index
      %18 = vector.load %arg4[%c0_16, %c0_17] : memref<128x128xf32, #tpu.memory_space<vmem>>, vector<128x128xf32>
      %c0_18 = arith.constant 0 : index
      %c0_19 = arith.constant 0 : index
      %19 = vector.load %arg7[%c0_18, %c0_19] : memref<128x128xf32, #tpu.memory_space<vmem>>, vector<128x128xf32>
      %cst_20 = arith.constant dense<0.000000e+00> : vector<128x128xf32>
      %20 = tpu.matmul %18, %19, %cst_20 {dimension_numbers = #tpu.dot_dimension_numbers<[1], [0], [0], [1], [0, 0, 1, 1], [], []>} : vector<128x128xf32>, vector<128x128xf32>, vector<128x128xf32> -> vector<128x128xf32>
      %21 = arith.addf %17, %20 : vector<128x128xf32>
      %c0_21 = arith.constant 0 : index
      %c0_22 = arith.constant 0 : index
      %22 = vector.load %arg8[%c0_21, %c0_22] : memref<1x128xf32, #tpu.memory_space<vmem>>, vector<1x128xf32>
      %23 = vector.broadcast %22 : vector<1x128xf32> to vector<128x128xf32>
      %24 = arith.addf %21, %23 : vector<128x128xf32>
      %c0_23 = arith.constant 0 : index
      %c0_24 = arith.constant 0 : index
      %25 = vector.load %arg9[%c0_23, %c0_24] : memref<1x128xf32, #tpu.memory_space<vmem>>, vector<1x128xf32>
      %26 = vector.broadcast %25 : vector<1x128xf32> to vector<128x128xf32>
      %27 = arith.subf %24, %26 : vector<128x128xf32>
      %28 = arith.mulf %27, %27 : vector<128x128xf32>
      %cst_25 = arith.constant dense<0.000000e+00> : vector<128xf32>
      %29 = vector.multi_reduction <add>, %28, %cst_25 [1] : vector<128x128xf32> to vector<128xf32>
      %30 = vector.shape_cast %29 : vector<128xf32> to vector<128x1xf32>
      %cst_26 = arith.constant 9.99999997E-7 : f32
      %31 = vector.broadcast %cst_26 : f32 to vector<128x1xf32>
      %32 = arith.addf %31, %30 : vector<128x1xf32>
      %33 = math.rsqrt %32 : vector<128x1xf32>
      %cst_27 = arith.constant 1.000000e+00 : f32
      %34 = vector.broadcast %cst_27 : f32 to vector<128x1xf32>
      %35 = arith.mulf %34, %33 : vector<128x1xf32>
      %36 = vector.broadcast %35 : vector<128x1xf32> to vector<128x128xf32>
      %37 = arith.mulf %27, %36 : vector<128x128xf32>
      %cst_28 = arith.constant 0.000000e+00 : f32
      %38 = vector.broadcast %cst_28 : f32 to vector<128x128xf32>
      %39 = arith.maximumf %37, %38 : vector<128x128xf32>
      %c0_29 = arith.constant 0 : index
      %c0_30 = arith.constant 0 : index
      %40 = vector.load %arg10[%c0_29, %c0_30] : memref<128x128xf32, #tpu.memory_space<vmem>>, vector<128x128xf32>
      tpu.vector_store %arg10[%c0_29, %c0_30], %39 {strides = array<i32>} : memref<128x128xf32, #tpu.memory_space<vmem>>, vector<128x128xf32>,
    } else {
    }
    return
  }
  func.func @transform_0(%arg0: i32, %arg1: i32) -> (i32, i32) {
    %c0_i32 = arith.constant 0 : i32
    return %arg0, %arg1 : i32, i32
  }
  func.func @transform_1(%arg0: i32, %arg1: i32) -> (i32, i32) {
    %c0_i32 = arith.constant 0 : i32
    %c0_i32_0 = arith.constant 0 : i32
    return %arg1, %c0_i32 : i32, i32
  }
  func.func @transform_2(%arg0: i32, %arg1: i32) -> (i32, i32) {
    %c0_i32 = arith.constant 0 : i32
    %c0_i32_0 = arith.constant 0 : i32
    return %arg0, %c0_i32 : i32, i32
  }
  func.func @transform_3(%arg0: i32, %arg1: i32) -> (i32, i32) {
    %c0_i32 = arith.constant 0 : i32
    %c0_i32_0 = arith.constant 0 : i32
    return %arg0, %c0_i32 : i32, i32
  }
  func.func @transform_4(%arg0: i32, %arg1: i32) -> (i32, i32) {
    %c0_i32 = arith.constant 0 : i32
    %c0_i32_0 = arith.constant 0 : i32
    %c0_i32_1 = arith.constant 0 : i32
    return %c0_i32, %c0_i32_0 : i32, i32
  }
  func.func @transform_5(%arg0: i32, %arg1: i32) -> (i32, i32) {
    %c0_i32 = arith.constant 0 : i32
    %c0_i32_0 = arith.constant 0 : i32
    %c0_i32_1 = arith.constant 0 : i32
    return %c0_i32, %c0_i32_0 : i32, i32
  }
  func.func @transform_6(%arg0: i32, %arg1: i32) -> (i32, i32) {
    %c0_i32 = arith.constant 0 : i32
    %c0_i32_0 = arith.constant 0 : i32
    %c0_i32_1 = arith.constant 0 : i32
    return %c0_i32, %c0_i32_0 : i32, i32
  }
  func.func @transform_7(%arg0: i32, %arg1: i32) -> (i32, i32) {
    %c0_i32 = arith.constant 0 : i32
    %c0_i32_0 = arith.constant 0 : i32
    %c0_i32_1 = arith.constant 0 : i32
    return %c0_i32, %c0_i32_0 : i32, i32
  }
  func.func @transform_8(%arg0: i32, %arg1: i32) -> (i32, i32) {
    %c0_i32 = arith.constant 0 : i32
    %c0_i32_0 = arith.constant 0 : i32
    return %arg0, %c0_i32 : i32, i32
  }
}

</mosaic_0001>

<bundles_post_ra>
// kernel: tpu_custom_call.1
= control target key start
LH: loop header
LB: loop body
LE: loop exit
PB: predicated region body
PF: predicated region fallthrough
CT: control target
= control target key end

     0   :  { %s2916_s0 = inlined_call_operand.hbm [shape: bf16[384,384], index: 0, kind: input, shape index: {}]   ;;  %s2917_s1 = inlined_call_operand.hbm [shape: bf16[384,128], index: 1, kind: input, shape index: {}]   ;;  %s2918_s2 = inlined_call_operand.vmem [shape: f32[384,128], index: 2, kind: input, shape index: {}]   ;;  %s2919_s3 = inlined_call_operand.vmem [shape: f32[384,1], index: 3, kind: input, shape index: {}]   ;;  %s2920_s4 = inlined_call_operand.hbm [shape: f32[128,128], index: 4, kind: input, shape index: {}]   ;;  %s2921_s5 = inlined_call_operand.hbm [shape: f32[128,128], index: 5, kind: input, shape index: {}]   ;;  %s2922_s6 = inlined_call_operand.vmem [shape: f32[1,128], index: 6, kind: input, shape index: {}]   ;;  %s2923_s7 = inlined_call_operand.vmem [shape: f32[1,128], index: 7, kind: input, shape index: {}]   ;;  %s2924_s8 = inlined_call_operand.hbm [shape: f32[384,128], index: 8, kind: output, shape index: {}]  }
   0x1   :  { %2942 = sst [smem:[#allocation27_spill]] %s2916_s0 }
   0x2   :  { %2943 = sst [smem:[#allocation28_spill]] %s2918_s2 }
   0x3   :  { %2944 = sst [smem:[#allocation29_spill]] %s2919_s3 }
   0x4   :  { %2945 = sst [smem:[#allocation30_spill]] %s2920_s4 }
   0x5   :  { %2946 = sst [smem:[#allocation31_spill]] %s2921_s5 }
   0x6   :  { %2947 = sst [smem:[#allocation32_spill]] %s2922_s6 }
   0x7   :  { %2948 = sst [smem:[#allocation33_spill]] %s2923_s7 }
   0x8   :  { %2949 = sst [smem:[#allocation34_spill]] %s2924_s8 }
   0x9   :  { %13 = vsyncpa [#allocation4], 0 }
   0xa   :  { %15 = vsyncpa [#allocation4 + $0x1], 0 }
   0xb   :  { %16 = vsyncpa [#allocation7], 0 }
   0xc   :  { %18 = vsyncpa [#allocation7 + $0x1], 0 }
   0xd   :  { %19 = vsyncpa [#allocation10], 0 }
   0xe   :  { %20 = vsyncpa [#allocation5], 0 }
   0xf   :  { %22 = vsyncpa [#allocation5 + $0x1], 0  ;;  %s2387_s27 = smov 0   ;;  %s2389_s28 = smov 0  }
  0x10   :  { %s2391_s29 = smov 0   ;;  %s2393_s30 = smov 0  }
  0x11   :  { %s2395_s9 = smov 0   ;;  %s2397_s10 = smov 0  }
  0x12   :  { %s2399_s11 = smov 0   ;;  %s2401_s12 = smov 0  }
  0x13   :  { %s2403_s13 = smov 0   ;;  %s2405_s14 = smov 0  }
  0x14   :  { %s2407_s15 = smov 0   ;;  %s2409_s16 = smov 0  }
  0x15   :  { %s2411_s17 = smov 0   ;;  %s2413_s18 = smov 0  }
  0x16 LB: > { %2950 = sst [smem:[#allocation17_spill]] %s2274_s27  ;;  %s2454_s19 = sadd.s32 4294967295, %s2326_s18   ;;  %s2326_s18 = sphi %s2413_s18, %s28_s18   ;;  %s2322_s17 = sphi %s2411_s17, %s3013_s17   ;;  %s2318_s16 = sphi %s2409_s16, %s3012_s16   ;;  %s2314_s15 = sphi %s2407_s15, %s3011_s15   ;;  %s2310_s14 = sphi %s2405_s14, %s3010_s14   ;;  %s2306_s13 = sphi %s2403_s13, %s3009_s13   ;;  %s2302_s12 = sphi %s2401_s12, %s3008_s12   ;;  %s2298_s11 = sphi %s2399_s11, %s3007_s11   ;;  %s2294_s10 = sphi %s2397_s10, %s3006_s10   ;;  %s2290_s9 = sphi %s2395_s9, %s3005_s9   ;;  %s2286_s30 = sphi %s2393_s30, %s3004_s30   ;;  %s2282_s29 = sphi %s2391_s29, %s3003_s29   ;;  %s2278_s28 = sphi %s2389_s28, %s3002_s28   ;;  %s2274_s27 = sphi %s2387_s27, %s2999_s27  }
  0x17   : > { %2951 = sst [smem:[#allocation18_spill]] %s2278_s28  ;;  %s1561_s20 = sadd.s32 4294967294, %s2326_s18  }
  0x18   : > { %2952 = sst [smem:[#allocation19_spill]] %s2310_s14  ;;  %p62_p0 = scmp.ne.s32.totalorder %s2302_s12, %s2298_s11 }
  0x19   : > { %2953 = sst [smem:[#allocation20_spill]] %s2314_s15  ;;  %p2930_p1 = scmp.eq.s32.totalorder %s2454_s19, 0 }
  0x1a   : > { %2954 = sst [smem:[#allocation21_spill]] %s2454_s19  ;;  %p88_p2 = scmp.ne.s32.totalorder %s2290_s9, %s2286_s30 }
  0x1b   : > { %p2463_p3 = por %p2930_p1, %p62_p0  ;;  %p247_p4 = scmp.ne.s32.totalorder %s2282_s29, %s2278_s28 }
  0x1c   : > { %p2471_p5 = por %p88_p2, %p2930_p1  ;;  %p248_p6 = scmp.eq.s32.totalorder %s2454_s19, 8 }
  0x1d   : > { %p253_p7 = scmp.ne.s32.totalorder %s2278_s28, %s2274_s27  ;;  %p254_p8 = scmp.eq.s32.totalorder %s1561_s20, 8 }
  0x1e   : > { %s2956_s23 = scalar_select %p2471_p5, 1, 0 }
  0x1f   : > { %p2478_p9 = por %p248_p6, %p247_p4  ;;  %p1562_p10 = scmp.ge.s32.totalorder %s2326_s18, 1 }
  0x20   : > { %2957 = sst [smem:[#allocation22_spill]] %s2956_s23  ;;  %p2483_p11 = por %p254_p8, %p253_p7 }
  0x21   : > { %s2958_s24 = scalar_select %p2478_p9, 1, 0 }
  0x22   : > { %s2960_s25 = scalar_select %p2483_p11, 1, 0 }
  0x23   : > { %2959 = sst [smem:[#allocation23_spill]] %s2958_s24  ;;  %p261_p12 = scmp.lt.s32.totalorder %s2326_s18, 10 }
  0x24   : > { %2961 = sst [smem:[#allocation24_spill]] %s2960_s25  ;;  %s2328_s30 = smov [#allocation8]  }
  0x25   : > { %p2488_p13 = pnand %p1562_p10, %p261_p12  ;;  %s273_s11 = sshll.u32 %s2328_s30, 4  ;;  %s274_s11 = int_to_ptr.vmem [resolvable:$true] %s273_s11 }
  0x26   : > { %s2329_s21 = smov [#allocation9]   ;;  %s2073_s27 = scalar_lea.vmem %s274_s11, 2048 }
  0x27   : > { %p1865_p0 = pneg %p2488_p13  ;;  %s286_s25 = sshll.u32 %s2329_s21, 4  ;;  %s287_s25 = int_to_ptr.vmem [resolvable:$true] %s286_s25 }
  0x28   : > { %p2074_p6 = scmp.ne.s32.totalorder %s274_s11, %s2073_s27  ;;  %p2081_p10 = scmp.lt.s32.totalorder %s274_s11, %s274_s11 }
  0x29   : > { %p2496_p2 = pnand %p1865_p0, %p2930_p1  ;;  %p2082_p12 = scmp.lt.s32.totalorder %s2073_s27, %s2073_s27 }
  0x2b   : > { %p2064_p4 = pneg %p2496_p2  ;;  %p2083_p11 = por %p2082_p12, %p2081_p10 }
  0x2d   : > { %p2076_p7 = pnand %p2074_p6, %p2064_p4 }
  0x2f   : > { %p2077_p8 = pneg %p2076_p7 }
  0x31   : > { %p2084_p0 = pnand %p2083_p11, %p2077_p8 }
  0x33   : > { %2087 = shalt.err (!%p2084_p0)
}
  0x34   : > { %s2330_s30 = smov 128   ;;  %s2331_s8 = smov 8  }
  0x35   : > { %s2964_s4 = sld [smem:[#allocation30_spill]]  ;;  %s2099_s7 = scalar_lea.vmem %s287_s25, 2048 }
  0x36   : > { %p2100_p1 = scmp.ne.s32.totalorder %s287_s25, %s2099_s7  ;;  %p2107_p9 = scmp.lt.s32.totalorder %s287_s25, %s287_s25 }
  0x37   : > { %p2108_p5 = scmp.lt.s32.totalorder %s2099_s7, %s2099_s7 }
  0x38   : > { %p2102_p6 = pnand %p2100_p1, %p2064_p4 }
  0x39   : > { %p2109_p10 = por %p2108_p5, %p2107_p9 }
  0x3a   : > { %p2103_p7 = pneg %p2102_p6 }
  0x3b   : > { %1868 = dma.hbm_to_vmem [thread:$0]  (!%p2496_p2), %s2964_s4, 2048, %s274_s11, [#allocation7], %s2330_s30, %s2330_s30, %s2331_s8  }
  0x3c   : > { %p2110_p11 = pnand %p2109_p10, %p2103_p7 }
  0x3e   : > { %2113 = shalt.err (!%p2110_p11)
}
  0x3f   : > { %s2965_s5 = sld [smem:[#allocation31_spill]]  ;;  %s37_s7 = sadd.s32 1, %s2318_s16 }
  0x40   : > { %s40_s24 = sadd.s32 1, %s2322_s17  ;;  %p38_p1 = scmp.ge.s32.totalorder %s37_s7, 3 }
  0x41   : > { %s49_s11 = sadd.s32 1, %s2306_s13  ;;  %p56_p5 = scmp.ne.s32.totalorder %s2306_s13, %s2302_s12 }
  0x42   : > { %p2940_p9 = scmp.eq.s32.totalorder %s2326_s18, 0  ;;  %s3015_s7 = smov (%p38_p1, %s37_s7), 0 }
  0x43   : > { %2966 = sst [smem:[#allocation25_spill]] %s3015_s7  ;;  %s3017_s24 = smov (!%p38_p1, %s40_s24), %s2322_s17 }
  0x44   : > { %s2529_s6 = ssub.s32 %s2318_s16, %s3015_s7  ;;  %p42_p4 = scmp.ge.s32.totalorder %s3017_s24, 3 }
  0x45   : > { %1871 = dma.hbm_to_vmem [thread:$0]  (!%p2496_p2), %s2965_s5, 2048, %s287_s25, [#allocation10], %s2330_s30, %s2330_s30, %s2331_s8  }
  0x46   : > { %p2533_p2 = por %p2940_p9, %p56_p5  ;;  %p73_p8 = scmp.eq.s32.totalorder %s2529_s6, 0 }
  0x47   : > { %p1885_p12 = scmp.lt.s32.totalorder %s2326_s18, 9  ;;  %s306_s25 = sand.u32 1, %s2306_s13  }
  0x48   : > { %s3019_s24 = smov (%p42_p4, %s3017_s24), 0  ;;  %s1566_s20 = sshll.u32 %s306_s25, 6 }
  0x49   : > { %2968 = sst [smem:[#allocation26_spill]] %s3019_s24  ;;  %s44_s30 = ssub.s32 %s2322_s17, %s3019_s24 }
  0x4a   : > { %s46_s21 = sor.u32 %s2529_s6, %s44_s30  ;;  %p235_p0 = scmp.eq.s32.totalorder %s44_s30, 0 }
  0x4b   : > { %p47_p6 = scmp.eq.s32.totalorder %s46_s21, 0  ;;  %s1850_s27 = smul.u32 48, %s2322_s17 }
  0x4c   : > { %s2969_s4 = sadd.s32 1, %s2282_s29  ;;  %s310_s3 = scalar_lea.vmem [#allocation3], %s1566_s20 }
  0x4d   : > { %s2549_s5 = scalar_select %p235_p0, %s2282_s29, %s2969_s4  }
  0x4e   : > { %s2552_s7 = scalar_select %p47_p6, %s2306_s13, %s49_s11  }
  0x4f   : > { %s316_s14 = sadd.s32 %s2318_s16, %s1850_s27  ;;  %s319_s2 = sshll.u32 %s310_s3, 4  ;;  %s320_s2 = int_to_ptr.vmem [resolvable:$true] %s319_s2 }
  0x50   : > { %s1569_s15 = sshll.u32 %s316_s14, 6  ;;  %s2970_s0 = sld [smem:[#allocation27_spill]] }
  0x51   : > { %p2562_p7 = pnand %p1885_p12, %p2533_p2  ;;  %s307_s4 = scalar_lea.sflag [#allocation4], %s306_s25 }
  0x52   : > { %s2127_s11 = scalar_lea.vmem %s320_s2, 1024  ;;  %s2332_s3 = smov [#allocation3]  }
  0x53   : > { %p2116_p10 = pneg %p2562_p7  ;;  %p2128_p11 = scmp.ne.s32.totalorder %s320_s2, %s2127_s11 }
  0x54   : > { %s2132_s14 = sshll.u32 %s2332_s3, 4  ;;  %s2133_s14 = int_to_ptr.vmem [resolvable:$false] %s2132_s14 }
  0x55   : > { %p2130_p1 = pnand %p2128_p11, %p2116_p10  ;;  %s2134_s20 = scalar_lea.vmem %s2133_s14, 2048 }
  0x56   : > { %s318_s19 = scalar_lea.hbm %s2970_s0, %s1569_s15  ;;  %p2135_p4 = scmp.lt.s32.totalorder %s320_s2, %s2133_s14 }
  0x57   : > { %p2131_p5 = pneg %p2130_p1  ;;  %p2136_p0 = scmp.lt.s32.totalorder %s2134_s20, %s2127_s11 }
  0x59   : > { %p2137_p6 = por %p2136_p0, %p2135_p4 }
  0x5b   : > { %p2138_p9 = pnand %p2137_p6, %p2131_p5 }
  0x5d   : > { %2141 = shalt.err (!%p2138_p9)
}
  0x5e   : > { %s2333_s28 = smov 192   ;;  %s2334_s15 = smov 64  }
  0x5f   : > { %s2335_s23 = smov 4   ;;  %s329_s8 = sand.u32 1, %s2326_s18  }
  0x60   : > { %1875 = dma.hbm_to_vmem [thread:$0]  (!%p2562_p7), %s318_s19, 1024, %s320_s2, %s307_s4, %s2333_s28, %s2334_s15, %s2335_s23  }
  0x61   : > { %s75_s25 = sadd.s32 1, %s2294_s10  ;;  %p82_p9 = scmp.ne.s32.totalorder %s2294_s10, %s2290_s9 }
  0x62   : > { %s2579_s21 = scalar_select %p73_p8, %s2294_s10, %s75_s25  }
  0x63   : > { %p2972_p2 = scmp.eq.s32.totalorder %s2326_s18, 0  ;;  %s331_s27 = sand.u32 1, %s2294_s10  }
  0x64   : > { %s1570_s11 = sshll.u32 %s331_s27, 6  ;;  %s1608_s3 = sshll.u32 %s2318_s16, 10 }
  0x65   : > { %p84_p10 = por %p82_p9, %p2972_p2  ;;  %s339_s0 = scalar_lea.hbm %s2917_s1, %s1608_s3 }
  0x66   : > { %s333_s24 = scalar_lea.vmem [#allocation6], %s1570_s11  ;;  %s330_s19 = scalar_lea.sflag [#allocation7], %s329_s8 }
  0x67   : > { %s340_s30 = sshll.u32 %s333_s24, 4  ;;  %p2590_p11 = pnand %p1885_p12, %p84_p10  ;;  %s341_s30 = int_to_ptr.vmem [resolvable:$true] %s340_s30 }
  0x68   : > { %s2155_s6 = scalar_lea.vmem %s341_s30, 1024  ;;  %s2336_s4 = smov [#allocation6]  }
  0x69   : > { %p2144_p8 = pneg %p2590_p11  ;;  %p2156_p7 = scmp.ne.s32.totalorder %s341_s30, %s2155_s6 }
  0x6a   : > { %s2160_s28 = sshll.u32 %s2336_s4, 4  ;;  %s2161_s28 = int_to_ptr.vmem [resolvable:$false] %s2160_s28 }
  0x6b   : > { %p2158_p1 = pnand %p2156_p7, %p2144_p8  ;;  %s2162_s25 = scalar_lea.vmem %s2161_s28, 2048 }
  0x6c   : > { %p2163_p4 = scmp.lt.s32.totalorder %s341_s30, %s2161_s28  ;;  %p2164_p0 = scmp.lt.s32.totalorder %s2162_s25, %s2155_s6 }
  0x6d   : > { %p2159_p5 = pneg %p2158_p1 }
  0x6e   : > { %p2165_p6 = por %p2164_p0, %p2163_p4 }
  0x70   : > { %p2166_p12 = pnand %p2165_p6, %p2159_p5 }
  0x72   : > { %2169 = shalt.err (!%p2166_p12)
}
  0x73   : > { %1878 = dma.hbm_to_vmem [thread:$0]  (!%p2590_p11), %s339_s0, 1024, %s341_s30, %s330_s19, %s2334_s15, %s2334_s15, %s2335_s23  }
  0x74   : > { %370 = sbr.rel (%p2488_p13) target bundleno = 964 (0x3c4), region = 52  ;;  %s372_s24 = sand.u32 (!%p2488_p13), 1, %s2302_s12  }
  0x75   : > { %s1574_s8 = sshll.u32 (!%p2488_p13), %s372_s24, 6  ;;  %s373_s27 = scalar_lea.sflag (!%p2488_p13), [#allocation4], %s372_s24 }
  0x76   : > { %s2604_s11 = scalar_lea.vmem (!%p2488_p13), [#allocation3], %s1574_s8 }
  0x79   : > { %2253 = dma.done.wait (%p2463_p3), %s373_s27, 1024  }
  0x7a   : > { %2255 = vsyncadd (%p2463_p3), %s373_s27, 4294966272  ;;  %s2974_s3 = sld [smem:[#allocation21_spill]]  ;;  %s383_s0 = sand.u32 1, %s2290_s9  }
  0x7b   : > { %s2975_s14 = sld [smem:[#allocation22_spill]]  ;;  %s1575_s15 = sshll.u32 %s383_s0, 6 }
  0x7c   : > { %s2612_s23 = scalar_lea.vmem [#allocation6], %s1575_s15 }
  0x80   : > { %s381_s20 = sand.u32 1, %s2974_s3  }
  0x81   : > { %s382_s26 = scalar_lea.sflag [#allocation7], %s381_s20  ;;  %p2976_p13 = scmp.ne.s32.totalorder %s2975_s14, 0 }
  0x83   : > { %2257 = dma.done.wait (%p2976_p13), %s382_s26, 1024  }
  0x84   : > { %2259 = vsyncadd (%p2976_p13), %s382_s26, 4294966272  ;;  %p2977_p9 = scmp.eq.s32.totalorder %s2974_s3, 0 }
  0x86   : > { %2261 = dma.done.wait (%p2977_p9), [#allocation7], 2048   ;;  %p2978_p2 = pmov %p2977_p9 }
  0x88   : > { %2263 = vsyncadd (%p2978_p2), [#allocation7], 4294965248  ;;  %p2979_p3 = pmov %p2978_p2 }
  0x89   : > { %p2980_p10 = pmov %p2978_p2 }
  0x8a   : > { %2265 = dma.done.wait (%p2979_p3), [#allocation10], 2048  }
  0x8b   : > { %2267 = vsyncadd (%p2980_p10), [#allocation10], 4294965248  ;;  %s2981_s22 = sld [smem:[#allocation18_spill]] }
  0x8c   : > { %s2982_s30 = sld [smem:[#allocation20_spill]] }
  0x8d   : > { %s2983_s24 = sld [smem:[#allocation28_spill]] }
  0x8e   : > { %s2984_s20 = sld [smem:[#allocation29_spill]] }
  0x8f   : > { %s2985_s15 = sld [smem:[#allocation19_spill]] }
  0x91   : > { %s438_s2 = sand.u32 1, %s2981_s22  }
  0x92   : > { %s1579_s19 = sshll.u32 %s2982_s30, 4  ;;  %s1578_s6 = sshll.u32 %s438_s2, 7 }
  0x93   : > { %p444_p11 = scmp.lt.s32.totalorder %s1579_s19, 47  ;;  %s2640_s0 = scalar_lea.vmem [#allocation11], %s1578_s6 }
  0x95   : > { %s3021_s19 = smov (!%p444_p11, %s1579_s19), 47  ;;  %p1583_p8 = scmp.ne.s32.totalorder %s2985_s15, 0 }
  0x96   : > { %s1580_s4 = sshll.u32 %s3021_s19, 3 }
  0x97   : > { %s2633_s8 = scalar_lea.vmem %s2983_s24, %s1580_s4  ;;  %s2638_s3 = scalar_lea.vmem %s2984_s20, %s1580_s4 }
  0x98   : > { %460 = sbr.rel (%p1583_p8) target bundleno = 166 (0xa6), region = 72 }
  0x9d   : > { %v2337_v0 = vmov 0.0  }
  0x9e   : > { %461 = vst [vmem:[#allocation2 + $0x30] sm:$0xff] %v2337_v0  ;;  %462 = vst [vmem:[#allocation2] sm:$0xff] %v2337_v0 }
  0x9f   : > { %463 = vst [vmem:[#allocation2 + $0x58] sm:$0xff] %v2337_v0  ;;  %464 = vst [vmem:[#allocation2 + $0x18] sm:$0xff] %v2337_v0 }
  0xa0   : > { %465 = vst [vmem:[#allocation2 + $0x50] sm:$0xff] %v2337_v0  ;;  %466 = vst [vmem:[#allocation2 + $0x68] sm:$0xff] %v2337_v0 }
  0xa1   : > { %467 = vst [vmem:[#allocation2 + $0x8] sm:$0xff] %v2337_v0  ;;  %468 = vst [vmem:[#allocation2 + $0x48] sm:$0xff] %v2337_v0 }
  0xa2   : > { %469 = vst [vmem:[#allocation2 + $0x40] sm:$0xff] %v2337_v0  ;;  %470 = vst [vmem:[#allocation2 + $0x20] sm:$0xff] %v2337_v0 }
  0xa3   : > { %471 = vst [vmem:[#allocation2 + $0x10] sm:$0xff] %v2337_v0  ;;  %472 = vst [vmem:[#allocation2 + $0x38] sm:$0xff] %v2337_v0 }
  0xa4   : > { %473 = vst [vmem:[#allocation2 + $0x60] sm:$0xff] %v2337_v0  ;;  %474 = vst [vmem:[#allocation2 + $0x70] sm:$0xff] %v2337_v0 }
  0xa5   : > { %475 = vst [vmem:[#allocation2 + $0x78] sm:$0xff] %v2337_v0  ;;  %476 = vst [vmem:[#allocation2 + $0x28] sm:$0xff] %v2337_v0 }
  0xa6 PF: > { %v2012_v1 = vld [vmem:[%s2612_s23 + $0x38] sm:$0xff]   ;;  %v2013_v2 = vld [vmem:[%s2612_s23 + $0x30] sm:$0xff]   ;;  %v2014_v3 = vld [vmem:[%s2612_s23 + $0x28] sm:$0xff]  }
  0xa7   : > { %1690 = vmatprep.subr.bf16.mxu0 %v2012_v1  ;;  %1834 = vmatprep.subr.bf16.mxu1 %v2012_v1  ;;  %v2015_v4 = vld [vmem:[%s2612_s23 + $0x20] sm:$0xff]   ;;  %v2016_v7 = vld [vmem:[%s2612_s23 + $0x18] sm:$0xff]   ;;  %v2017_v8 = vld [vmem:[%s2612_s23 + $0x10] sm:$0xff]  }
  0xa8   : > { %1691 = vmatpush3.bf16.msra.mxu0 %v2012_v1  ;;  %1842 = vmatpush3.bf16.msra.mxu1 %v2012_v1  ;;  %v2020_v5 = vld [vmem:[%s2604_s11] sm:$0xff]   ;;  %v2018_v9 = vld [vmem:[%s2612_s23 + $0x8] sm:$0xff]   ;;  %v2024_v13 = vld [vmem:[%s2604_s11 + $0x10] sm:$0xff]  }
  0xa9   : > { %1692 = vmatprep.subr.bf16.mxu0 %v2013_v2  ;;  %1835 = vmatprep.subr.bf16.mxu1 %v2013_v2  ;;  %v2021_v6 = vld [vmem:[%s2604_s11 + $0x20] sm:$0xff]   ;;  %v2022_v11 = vld [vmem:[%s2604_s11 + $0x8] sm:$0xff]   ;;  %v2025_v14 = vld [vmem:[%s2604_s11 + $0x30] sm:$0xff]  }
  0xaa   : > { %1706 = vmatprep.mubr.bf16.mxu0 %v2020_v5  ;;  %1714 = vmatprep.mubr.bf16.mxu1 %v2021_v6  ;;  %v2019_v10 = vld [vmem:[%s2612_s23] sm:$0xff]   ;;  %v2023_v12 = vld [vmem:[%s2604_s11 + $0x28] sm:$0xff]   ;;  %v2026_v15 = vld [vmem:[%s2604_s11 + $0x18] sm:$0xff]  }
  0xab   : > { %v2027_v16 = vld [vmem:[%s2604_s11 + $0x38] sm:$0xff]   ;;  %v487_v18 = vld [vmem:[#allocation2 + $0x10] sm:$0xff]  ;;  %v485_v22 = vld [vmem:[#allocation2 + $0x40] sm:$0xff]  ;;  %s2986_s11 = sld [smem:[#allocation19_spill]] }
  0xac   : > { %1693 = vmatpush3.bf16.msra.mxu0 %v2013_v2  ;;  %1843 = vmatpush3.bf16.msra.mxu1 %v2013_v2  ;;  %v479_v17 = vld [vmem:[#allocation2 + $0x58] sm:$0xff]  ;;  %v477_v21 = vld [vmem:[#allocation2 + $0x30] sm:$0xff]  ;;  %v478_v33 = vld [vmem:[#allocation2] sm:$0xff] }
  0xad   : > { %1694 = vmatprep.subr.bf16.mxu0 %v2014_v3  ;;  %1836 = vmatprep.subr.bf16.mxu1 %v2014_v3  ;;  %v480_v27 = vld [vmem:[#allocation2 + $0x18] sm:$0xff]  ;;  %v486_v34 = vld [vmem:[#allocation2 + $0x20] sm:$0xff]  ;;  %v483_v39 = vld [vmem:[#allocation2 + $0x8] sm:$0xff] }
  0xae   : > { %v488_v28 = vld [vmem:[#allocation2 + $0x38] sm:$0xff]  ;;  %v481_v45 = vld [vmem:[#allocation2 + $0x50] sm:$0xff]  ;;  %v489_v46 = vld [vmem:[#allocation2 + $0x60] sm:$0xff] }
  0xaf   : > { %v491_v40 = vld [vmem:[#allocation2 + $0x78] sm:$0xff]  ;;  %v484_v51 = vld [vmem:[#allocation2 + $0x48] sm:$0xff]  ;;  %v490_v58 = vld [vmem:[#allocation2 + $0x70] sm:$0xff] }
  0xb0   : > { %1695 = vmatpush3.bf16.msra.mxu0 %v2014_v3  ;;  %1844 = vmatpush3.bf16.msra.mxu1 %v2014_v3  ;;  %v492_v52 = vld [vmem:[#allocation2 + $0x28] sm:$0xff] }
  0xb1   : > { %1696 = vmatprep.subr.bf16.mxu0 %v2015_v4  ;;  %1837 = vmatprep.subr.bf16.mxu1 %v2015_v4  ;;  %v482_v57 = vld [vmem:[#allocation2 + $0x68] sm:$0xff]  ;;  %p1600_p7 = scmp.ne.s32.totalorder %s2986_s11, 2 }
  0xb2   : > { %s2987_s22 = sld [smem:[#allocation32_spill]] (!%p1600_p7) }
  0xb3   : > { %s2988_s6 = sld [smem:[#allocation33_spill]] (!%p1600_p7) }
  0xb4   : > { %1697 = vmatpush3.bf16.msra.mxu0 %v2015_v4  ;;  %1845 = vmatpush3.bf16.msra.mxu1 %v2015_v4 }
  0xb5   : > { %1698 = vmatprep.subr.bf16.mxu0 %v2016_v7  ;;  %1838 = vmatprep.subr.bf16.mxu1 %v2016_v7 }
  0xb8   : > { %1699 = vmatpush3.bf16.msra.mxu0 %v2016_v7  ;;  %1846 = vmatpush3.bf16.msra.mxu1 %v2016_v7 }
  0xb9   : > { %1700 = vmatprep.subr.bf16.mxu0 %v2017_v8  ;;  %1839 = vmatprep.subr.bf16.mxu1 %v2017_v8 }
  0xbc   : > { %1701 = vmatpush3.bf16.msra.mxu0 %v2017_v8  ;;  %1847 = vmatpush3.bf16.msra.mxu1 %v2017_v8 }
  0xbd   : > { %1702 = vmatprep.subr.bf16.mxu0 %v2018_v9  ;;  %1840 = vmatprep.subr.bf16.mxu1 %v2018_v9 }
  0xc0   : > { %1703 = vmatpush3.bf16.msra.mxu0 %v2018_v9  ;;  %1848 = vmatpush3.bf16.msra.mxu1 %v2018_v9 }
  0xc1   : > { %1704 = vmatprep.subr.bf16.mxu0 %v2019_v10  ;;  %1841 = vmatprep.subr.bf16.mxu1 %v2019_v10 }
  0xc4   : > { %1705 = vmatpush3.bf16.msra.mxu0 %v2019_v10  ;;  %1849 = vmatpush3.bf16.msra.mxu1 %v2019_v10 }
  0xc7   : > { %1707 = vmatmul.mubr.bf16.vlgmr.msra.gmra.mxu0 %v2022_v11  ;;  %1715 = vmatmul.mubr.bf16.vlgmr.msra.gmra.mxu1 %v2023_v12 }
  0xc8   : > { %1710 = vmatprep.mubr.bf16.mxu0 %v2024_v13  ;;  %1718 = vmatprep.mubr.bf16.mxu1 %v2025_v14 }
  0xcf   : > { %1711 = vmatmul.mubr.bf16.gmra.mxu0 %v2026_v15  ;;  %1719 = vmatmul.mubr.bf16.gmra.mxu1 %v2027_v16 }
 0x187   : > { %v1708_v19 = vpop.f32.mrf.mxu0  ;;  %v1716_v20 = vpop.f32.mrf.mxu1 }
 0x188   : > { %v720_v23 = vadd.f32 %v1708_v19, %v479_v17  ;;  %v728_v24 = vadd.f32 %v1716_v20, %v487_v18 }
 0x189   : > { %v655_v25 = vpop.f32.mrf.mxu0  ;;  %v687_v26 = vpop.f32.mrf.mxu1 }
 0x18a   : > { %736 = vst [vmem:[#allocation2 + $0x58] sm:$0xff] %v720_v23  ;;  %744 = vst [vmem:[#allocation2 + $0x10] sm:$0xff] %v728_v24  ;;  %v718_v29 = vadd.f32 %v655_v25, %v477_v21  ;;  %v726_v30 = vadd.f32 %v687_v26, %v485_v22 }
 0x18b   : > { %v1709_v31 = vpop.f32.mrf.mxu0  ;;  %v1717_v32 = vpop.f32.mrf.mxu1 }
 0x18c   : > { %734 = vst [vmem:[#allocation2 + $0x30] sm:$0xff] %v718_v29  ;;  %742 = vst [vmem:[#allocation2 + $0x40] sm:$0xff] %v726_v30  ;;  %v721_v35 = vadd.f32 %v1709_v31, %v480_v27  ;;  %v729_v36 = vadd.f32 %v1717_v32, %v488_v28 }
 0x18d   : > { %v658_v37 = vpop.f32.mrf.mxu0  ;;  %v690_v38 = vpop.f32.mrf.mxu1 }
 0x18e   : > { %737 = vst [vmem:[#allocation2 + $0x18] sm:$0xff] %v721_v35  ;;  %745 = vst [vmem:[#allocation2 + $0x38] sm:$0xff] %v729_v36  ;;  %v719_v41 = vadd.f32 %v658_v37, %v478_v33  ;;  %v727_v42 = vadd.f32 %v690_v38, %v486_v34 }
 0x18f   : > { %v1712_v43 = vpop.f32.mrf.mxu0  ;;  %v1720_v44 = vpop.f32.mrf.mxu1 }
 0x190   : > { %735 = vst [vmem:[#allocation2] sm:$0xff] %v719_v41  ;;  %743 = vst [vmem:[#allocation2 + $0x20] sm:$0xff] %v727_v42  ;;  %v724_v47 = vadd.f32 %v1712_v43, %v483_v39  ;;  %v732_v48 = vadd.f32 %v1720_v44, %v491_v40 }
 0x191   : > { %v671_v49 = vpop.f32.mrf.mxu0  ;;  %v703_v50 = vpop.f32.mrf.mxu1 }
 0x192   : > { %740 = vst [vmem:[#allocation2 + $0x8] sm:$0xff] %v724_v47  ;;  %748 = vst [vmem:[#allocation2 + $0x78] sm:$0xff] %v732_v48  ;;  %v722_v53 = vadd.f32 %v671_v49, %v481_v45  ;;  %v730_v54 = vadd.f32 %v703_v50, %v489_v46 }
 0x193   : > { %v1713_v55 = vpop.f32.mrf.mxu0  ;;  %v1721_v56 = vpop.f32.mrf.mxu1 }
 0x194   : > { %738 = vst [vmem:[#allocation2 + $0x50] sm:$0xff] %v722_v53  ;;  %746 = vst [vmem:[#allocation2 + $0x60] sm:$0xff] %v730_v54  ;;  %v725_v59 = vadd.f32 %v1713_v55, %v484_v51  ;;  %v733_v60 = vadd.f32 %v1721_v56, %v492_v52  ;;  %753 = sbr.rel (%p1600_p7) target bundleno = 936 (0x3a8), region = 76 }
 0x195   : > { %v674_v61 = vpop.f32.mrf.mxu0  ;;  %v706_v62 = vpop.f32.mrf.mxu1 }
 0x196   : > { %741 = vst [vmem:[#allocation2 + $0x48] sm:$0xff] %v725_v59  ;;  %749 = vst [vmem:[#allocation2 + $0x28] sm:$0xff] %v733_v60  ;;  %v723_v63 = vadd.f32 %v674_v61, %v482_v57  ;;  %v731_v0 = vadd.f32 %v706_v62, %v490_v58 }
 0x198   : > { %739 = vst [vmem:[#allocation2 + $0x68] sm:$0xff] %v723_v63  ;;  %747 = vst [vmem:[#allocation2 + $0x70] sm:$0xff] %v731_v0 }
 0x199   : > { %v772_v1 = vld [vmem:[%s2638_s3 + $0x10] sm:$0xff]  ;;  %v770_v2 = vld [vmem:[%s2638_s3] sm:$0xff]  ;;  %v2338_v3 = vmov 0   ;;  %v773_v4 = vld [vmem:[%s2638_s3 + $0x18] sm:$0xff] }
 0x19a   : > { %2029 = vset.pattern.permute.xlu1 %v2338_v3  ;;  %2028 = vset.pattern.permute.xlu0 %v2338_v3  ;;  %v771_v5 = vld [vmem:[%s2638_s3 + $0x8] sm:$0xff]  ;;  %v929_v6 = vld [vmem:[#allocation9 + $0x78] sm:$0xff]  ;;  %v928_v7 = vld [vmem:[#allocation9 + $0x70] sm:$0xff] }
 0x19b   : > { %798 = vperm.xlu1 %2029, %v772_v1   ;;  %788 = vperm.xlu0 %2028, %v770_v2   ;;  %v897_v8 = vld [vmem:[#allocation8 + $0x78] sm:$0xff]  ;;  %v896_v9 = vld [vmem:[#allocation8 + $0x70] sm:$0xff]  ;;  %v775_v10 = vld [vmem:[%s2638_s3 + $0x28] sm:$0xff] }
 0x19c   : > { %v774_v11 = vld [vmem:[%s2638_s3 + $0x20] sm:$0xff]  ;;  %1722 = vmatprep.subr.mxu0 %v929_v6  ;;  %1778 = vmatprep.subr.mxu1 %v897_v8  ;;  %v927_v12 = vld [vmem:[#allocation9 + $0x68] sm:$0xff]  ;;  %v777_v14 = vld [vmem:[%s2638_s3 + $0x38] sm:$0xff] }
 0x19d   : > { %1723 = vmatpush3.msra.mxu0 %v929_v6  ;;  %1779 = vmatpush3.msra.mxu1 %v897_v8  ;;  %v895_v13 = vld [vmem:[#allocation8 + $0x68] sm:$0xff]  ;;  %v776_v15 = vld [vmem:[%s2638_s3 + $0x30] sm:$0xff]  ;;  %v926_v16 = vld [vmem:[#allocation9 + $0x60] sm:$0xff] }
 0x19e   : > { %1724 = vmatprep.subr.mxu0 %v928_v7  ;;  %1780 = vmatprep.subr.mxu1 %v896_v9  ;;  %v894_v17 = vld [vmem:[#allocation8 + $0x60] sm:$0xff]  ;;  %v925_v18 = vld [vmem:[#allocation9 + $0x58] sm:$0xff]  ;;  %v779_v20 = vld [vmem:[%s2638_s3 + $0x48] sm:$0xff] }
 0x19f   : > { %803 = vperm.xlu1 %2029, %v773_v4   ;;  %793 = vperm.xlu0 %2028, %v771_v5   ;;  %v893_v19 = vld [vmem:[#allocation8 + $0x58] sm:$0xff]  ;;  %v778_v21 = vld [vmem:[%s2638_s3 + $0x40] sm:$0xff]  ;;  %v924_v22 = vld [vmem:[#allocation9 + $0x50] sm:$0xff] }
 0x1a0   : > { %1725 = vmatpush3.msra.mxu0 %v928_v7  ;;  %1781 = vmatpush3.msra.mxu1 %v896_v9  ;;  %v892_v23 = vld [vmem:[#allocation8 + $0x50] sm:$0xff]  ;;  %v781_v24 = vld [vmem:[%s2638_s3 + $0x58] sm:$0xff]  ;;  %v923_v26 = vld [vmem:[#allocation9 + $0x48] sm:$0xff] }
 0x1a1   : > { %1726 = vmatprep.subr.mxu0 %v927_v12  ;;  %1782 = vmatprep.subr.mxu1 %v895_v13  ;;  %v780_v25 = vld [vmem:[%s2638_s3 + $0x50] sm:$0xff]  ;;  %v891_v27 = vld [vmem:[#allocation8 + $0x48] sm:$0xff]  ;;  %v922_v28 = vld [vmem:[#allocation9 + $0x40] sm:$0xff] }
 0x1a2   : > { %1727 = vmatpush3.msra.mxu0 %v927_v12  ;;  %1783 = vmatpush3.msra.mxu1 %v895_v13  ;;  %v890_v29 = vld [vmem:[#allocation8 + $0x40] sm:$0xff]  ;;  %v783_v30 = vld [vmem:[%s2638_s3 + $0x68] sm:$0xff]  ;;  %v921_v32 = vld [vmem:[#allocation9 + $0x38] sm:$0xff] }
 0x1a3   : > { %813 = vperm.xlu1 %2029, %v775_v10   ;;  %808 = vperm.xlu0 %2028, %v774_v11   ;;  %v782_v31 = vld [vmem:[%s2638_s3 + $0x60] sm:$0xff]  ;;  %v889_v33 = vld [vmem:[#allocation8 + $0x38] sm:$0xff]  ;;  %v784_v35 = vld [vmem:[%s2638_s3 + $0x70] sm:$0xff] }
 0x1a4   : > { %1728 = vmatprep.subr.mxu0 %v926_v16  ;;  %1784 = vmatprep.subr.mxu1 %v894_v17  ;;  %v785_v34 = vld [vmem:[%s2638_s3 + $0x78] sm:$0xff]  ;;  %v920_v36 = vld [vmem:[#allocation9 + $0x30] sm:$0xff]  ;;  %v919_v38 = vld [vmem:[#allocation9 + $0x28] sm:$0xff] }
 0x1a5   : > { %1729 = vmatpush3.msra.mxu0 %v926_v16  ;;  %1785 = vmatpush3.msra.mxu1 %v894_v17  ;;  %v888_v37 = vld [vmem:[#allocation8 + $0x30] sm:$0xff]  ;;  %v887_v39 = vld [vmem:[#allocation8 + $0x28] sm:$0xff]  ;;  %v918_v40 = vld [vmem:[#allocation9 + $0x20] sm:$0xff] }
 0x1a6   : > { %1730 = vmatprep.subr.mxu0 %v925_v18  ;;  %1786 = vmatprep.subr.mxu1 %v893_v19  ;;  %v886_v41 = vld [vmem:[#allocation8 + $0x20] sm:$0xff]  ;;  %v917_v42 = vld [vmem:[#allocation9 + $0x18] sm:$0xff]  ;;  %v916_v44 = vld [vmem:[#allocation9 + $0x10] sm:$0xff] }
 0x1a7   : > { %823 = vperm.xlu1 %2029, %v777_v14   ;;  %818 = vperm.xlu0 %2028, %v776_v15   ;;  %v885_v43 = vld [vmem:[#allocation8 + $0x18] sm:$0xff]  ;;  %v884_v45 = vld [vmem:[#allocation8 + $0x10] sm:$0xff]  ;;  %v915_v46 = vld [vmem:[#allocation9 + $0x8] sm:$0xff] }
 0x1a8   : > { %1731 = vmatpush3.msra.mxu0 %v925_v18  ;;  %1787 = vmatpush3.msra.mxu1 %v893_v19  ;;  %v883_v47 = vld [vmem:[#allocation8 + $0x8] sm:$0xff]  ;;  %v898_v48 = vld [vmem:[%s2633_s8] sm:$0xff]  ;;  %v900_v52 = vld [vmem:[%s2633_s8 + $0x10] sm:$0xff] }
 0x1a9   : > { %1732 = vmatprep.subr.mxu0 %v924_v22  ;;  %1788 = vmatprep.subr.mxu1 %v892_v23  ;;  %v914_v49 = vld [vmem:[#allocation9] sm:$0xff]  ;;  %v899_v51 = vld [vmem:[%s2633_s8 + $0x8] sm:$0xff]  ;;  %v901_v53 = vld [vmem:[%s2633_s8 + $0x18] sm:$0xff] }
 0x1aa   : > { %1733 = vmatpush3.msra.mxu0 %v924_v22  ;;  %1789 = vmatpush3.msra.mxu1 %v892_v23  ;;  %v882_v50 = vld [vmem:[#allocation8] sm:$0xff]  ;;  %v903_v55 = vld [vmem:[%s2633_s8 + $0x28] sm:$0xff]  ;;  %v904_v56 = vld [vmem:[%s2633_s8 + $0x30] sm:$0xff] }
 0x1ab   : > { %833 = vperm.xlu1 %2029, %v779_v20   ;;  %828 = vperm.xlu0 %2028, %v778_v21   ;;  %v902_v54 = vld [vmem:[%s2633_s8 + $0x20] sm:$0xff]  ;;  %v905_v57 = vld [vmem:[%s2633_s8 + $0x38] sm:$0xff]  ;;  %v907_v59 = vld [vmem:[%s2633_s8 + $0x48] sm:$0xff] }
 0x1ac   : > { %1734 = vmatprep.subr.mxu0 %v923_v26  ;;  %1790 = vmatprep.subr.mxu1 %v891_v27  ;;  %v906_v58 = vld [vmem:[%s2633_s8 + $0x40] sm:$0xff]  ;;  %v908_v60 = vld [vmem:[%s2633_s8 + $0x50] sm:$0xff]  ;;  %v909_v61 = vld [vmem:[%s2633_s8 + $0x58] sm:$0xff] }
 0x1ad   : > { %1735 = vmatpush3.msra.mxu0 %v923_v26  ;;  %1791 = vmatpush3.msra.mxu1 %v891_v27  ;;  %v910_v62 = vld [vmem:[%s2633_s8 + $0x60] sm:$0xff]  ;;  %v911_v63 = vld [vmem:[%s2633_s8 + $0x68] sm:$0xff]  ;;  %v912_v0 = vld [vmem:[%s2633_s8 + $0x70] sm:$0xff] }
 0x1ae   : > { %1736 = vmatprep.subr.mxu0 %v922_v28  ;;  %1792 = vmatprep.subr.mxu1 %v890_v29  ;;  %v913_v1 = vld [vmem:[%s2633_s8 + $0x78] sm:$0xff]  ;;  %v754_v2 = vld [vmem:[#allocation2 + $0x30] sm:$0xff]  ;;  %v755_v7 = vld [vmem:[#allocation2] sm:$0xff] }
 0x1af   : > { %843 = vperm.xlu1 %2029, %v781_v24   ;;  %838 = vperm.xlu0 %2028, %v780_v25   ;;  %v756_v5 = vld [vmem:[#allocation2 + $0x58] sm:$0xff]  ;;  %v758_v13 = vld [vmem:[#allocation2 + $0x50] sm:$0xff]  ;;  %v759_v18 = vld [vmem:[#allocation2 + $0x68] sm:$0xff] }
 0x1b0   : > { %1737 = vmatpush3.msra.mxu0 %v922_v28  ;;  %1793 = vmatpush3.msra.mxu1 %v890_v29  ;;  %v757_v12 = vld [vmem:[#allocation2 + $0x18] sm:$0xff]  ;;  %v760_v19 = vld [vmem:[#allocation2 + $0x8] sm:$0xff]  ;;  %v762_v25 = vld [vmem:[#allocation2 + $0x40] sm:$0xff] }
 0x1b1   : > { %1738 = vmatprep.subr.mxu0 %v921_v32  ;;  %1794 = vmatprep.subr.mxu1 %v889_v33  ;;  %v761_v24 = vld [vmem:[#allocation2 + $0x48] sm:$0xff] }
 0x1b2   : > { %1739 = vmatpush3.msra.mxu0 %v921_v32  ;;  %1795 = vmatpush3.msra.mxu1 %v889_v33 }
 0x1b3   : > { %853 = vperm.xlu1 %2029, %v783_v30   ;;  %848 = vperm.xlu0 %2028, %v782_v31   ;;  %v763_v30 = vld [vmem:[#allocation2 + $0x20] sm:$0xff]  ;;  %v764_v31 = vld [vmem:[#allocation2 + $0x10] sm:$0xff] }
 0x1b4   : > { %1740 = vmatprep.subr.mxu0 %v920_v36  ;;  %1796 = vmatprep.subr.mxu1 %v888_v37 }
 0x1b5   : > { %1741 = vmatpush3.msra.mxu0 %v920_v36  ;;  %1797 = vmatpush3.msra.mxu1 %v888_v37  ;;  %v765_v36 = vld [vmem:[#allocation2 + $0x38] sm:$0xff]  ;;  %v766_v37 = vld [vmem:[#allocation2 + $0x60] sm:$0xff] }
 0x1b6   : > { %1742 = vmatprep.subr.mxu0 %v919_v38  ;;  %1798 = vmatprep.subr.mxu1 %v887_v39 }
 0x1b7   : > { %863 = vperm.xlu1 %2029, %v785_v34   ;;  %858 = vperm.xlu0 %2028, %v784_v35  }
 0x1b8   : > { %1743 = vmatpush3.msra.mxu0 %v919_v38  ;;  %1799 = vmatpush3.msra.mxu1 %v887_v39 }
 0x1b9   : > { %1744 = vmatprep.subr.mxu0 %v918_v40  ;;  %1800 = vmatprep.subr.mxu1 %v886_v41 }
 0x1ba   : > { %1745 = vmatpush3.msra.mxu0 %v918_v40  ;;  %1801 = vmatpush3.msra.mxu1 %v886_v41 }
 0x1bb   : > { %1746 = vmatprep.subr.mxu0 %v917_v42  ;;  %1802 = vmatprep.subr.mxu1 %v885_v43 }
 0x1bc   : > { %1747 = vmatpush3.msra.mxu0 %v917_v42  ;;  %1803 = vmatpush3.msra.mxu1 %v885_v43  ;;  %v767_v42 = vld [vmem:[#allocation2 + $0x70] sm:$0xff]  ;;  %v768_v43 = vld [vmem:[#allocation2 + $0x78] sm:$0xff] }
 0x1bd   : > { %1748 = vmatprep.subr.mxu0 %v916_v44  ;;  %1804 = vmatprep.subr.mxu1 %v884_v45 }
 0x1be   : > { %1749 = vmatpush3.msra.mxu0 %v916_v44  ;;  %1805 = vmatpush3.msra.mxu1 %v884_v45 }
 0x1bf   : > { %1750 = vmatprep.subr.mxu0 %v915_v46  ;;  %1806 = vmatprep.subr.mxu1 %v883_v47 }
 0x1c0   : > { %1751 = vmatpush3.msra.mxu0 %v915_v46  ;;  %1754 = vmatprep.mubr.f32.mxu0 %v898_v48  ;;  %v769_v48 = vld [vmem:[#allocation2 + $0x28] sm:$0xff] }
 0x1c1   : > { %1752 = vmatprep.subr.mxu0 %v914_v49  ;;  %1807 = vmatpush3.msra.mxu1 %v883_v47 }
 0x1c2   : > { %1753 = vmatpush3.msra.mxu0 %v914_v49  ;;  %1808 = vmatprep.subr.mxu1 %v882_v50 }
 0x1c3   : > { %1755 = vmatmul.mubr.f32.vlgmr.msra.gmra.mxu0 %v899_v51  ;;  %1809 = vmatpush3.msra.mxu1 %v882_v50 }
 0x1c4   : > { %1757 = vmatprep.mubr.f32.mxu0 %v900_v52 }
 0x1c7   : > { %1758 = vmatmul.mubr.f32.gmra.mxu0 %v901_v53 }
 0x1c8   : > { %1760 = vmatprep.mubr.f32.mxu0 %v902_v54 }
 0x1cb   : > { %1761 = vmatmul.mubr.f32.gmra.mxu0 %v903_v55 }
 0x1cc   : > { %1763 = vmatprep.mubr.f32.mxu0 %v904_v56 }
 0x1cf   : > { %1764 = vmatmul.mubr.f32.gmra.mxu0 %v905_v57 }
 0x1d0   : > { %1766 = vmatprep.mubr.f32.mxu0 %v906_v58 }
 0x1d3   : > { %1767 = vmatmul.mubr.f32.gmra.mxu0 %v907_v59  ;;  %v2695_v59 = vld [vmem:[%s2987_s22] ss:$0 sm:$0xff] }
 0x1d4   : > { %1769 = vmatprep.mubr.f32.mxu0 %v908_v60 }
 0x1d7   : > { %1770 = vmatmul.mubr.f32.gmra.mxu0 %v909_v61 }
 0x1d8   : > { %1772 = vmatprep.mubr.f32.mxu0 %v910_v62 }
 0x1db   : > { %1773 = vmatmul.mubr.f32.gmra.mxu0 %v911_v63  ;;  %v2700_v63 = vld [vmem:[%s2988_s6] ss:$0 sm:$0xff] }
 0x1dc   : > { %1775 = vmatprep.mubr.f32.mxu0 %v912_v0 }
 0x1df   : > { %1776 = vmatmul.mubr.f32.gmra.mxu0 %v913_v1 }
 0x216   : > { %v799_v3 = vpop.permute.xlu1 %798  ;;  %v789_v4 = vpop.permute.xlu0 %788 }
 0x217   : > { %v866_v6 = vmul.f32 %v789_v4, %v754_v2  ;;  %v868_v8 = vmul.f32 %v799_v3, %v756_v5 }
 0x219   : > { %1810 = vmatprep.mubr.f32.mxu1 %v866_v6 }
 0x21a   : > { %v804_v9 = vpop.permute.xlu1 %803  ;;  %v794_v10 = vpop.permute.xlu0 %793 }
 0x21b   : > { %v867_v11 = vmul.f32 %v794_v10, %v755_v7  ;;  %v869_v16 = vmul.f32 %v804_v9, %v757_v12 }
 0x21d   : > { %1811 = vmatmul.mubr.f32.vlgmr.msra.gmra.mxu1 %v867_v11 }
 0x21e   : > { %v814_v14 = vpop.permute.xlu1 %813  ;;  %v809_v15 = vpop.permute.xlu0 %808  ;;  %1813 = vmatprep.mubr.f32.mxu1 %v868_v8 }
 0x21f   : > { %v870_v17 = vmul.f32 %v809_v15, %v758_v13  ;;  %v871_v22 = vmul.f32 %v814_v14, %v759_v18 }
 0x221   : > { %1814 = vmatmul.mubr.f32.gmra.mxu1 %v869_v16 }
 0x222   : > { %v824_v20 = vpop.permute.xlu1 %823  ;;  %v819_v21 = vpop.permute.xlu0 %818  ;;  %1816 = vmatprep.mubr.f32.mxu1 %v870_v17 }
 0x223   : > { %v872_v23 = vmul.f32 %v819_v21, %v760_v19  ;;  %v873_v28 = vmul.f32 %v824_v20, %v761_v24 }
 0x225   : > { %1817 = vmatmul.mubr.f32.gmra.mxu1 %v871_v22 }
 0x226   : > { %v834_v26 = vpop.permute.xlu1 %833  ;;  %v829_v27 = vpop.permute.xlu0 %828  ;;  %1819 = vmatprep.mubr.f32.mxu1 %v872_v23 }
 0x227   : > { %v874_v29 = vmul.f32 %v829_v27, %v762_v25  ;;  %v875_v34 = vmul.f32 %v834_v26, %v763_v30 }
 0x229   : > { %1820 = vmatmul.mubr.f32.gmra.mxu1 %v873_v28 }
 0x22a   : > { %v844_v32 = vpop.permute.xlu1 %843  ;;  %v839_v33 = vpop.permute.xlu0 %838  ;;  %1822 = vmatprep.mubr.f32.mxu1 %v874_v29 }
 0x22b   : > { %v876_v35 = vmul.f32 %v839_v33, %v764_v31  ;;  %v877_v40 = vmul.f32 %v844_v32, %v765_v36 }
 0x22d   : > { %1823 = vmatmul.mubr.f32.gmra.mxu1 %v875_v34 }
 0x22e   : > { %v854_v38 = vpop.permute.xlu1 %853  ;;  %v849_v39 = vpop.permute.xlu0 %848  ;;  %1825 = vmatprep.mubr.f32.mxu1 %v876_v35 }
 0x22f   : > { %v878_v41 = vmul.f32 %v849_v39, %v766_v37  ;;  %v879_v45 = vmul.f32 %v854_v38, %v767_v42 }
 0x231   : > { %1826 = vmatmul.mubr.f32.gmra.mxu1 %v877_v40 }
 0x232   : > { %v859_v44 = vpop.permute.xlu0 %858  ;;  %1828 = vmatprep.mubr.f32.mxu1 %v878_v41  ;;  %v864_v47 = vpop.permute.xlu1 %863 }
 0x233   : > { %v880_v46 = vmul.f32 %v859_v44, %v768_v43  ;;  %v881_v49 = vmul.f32 %v864_v47, %v769_v48 }
 0x235   : > { %1829 = vmatmul.mubr.f32.gmra.mxu1 %v879_v45 }
 0x236   : > { %1831 = vmatprep.mubr.f32.mxu1 %v880_v46 }
 0x239   : > { %1832 = vmatmul.mubr.f32.gmra.mxu1 %v881_v49 }
 0x283   : > { %v1756_v50 = vpop.f32.mrf.mxu0 }
 0x285   : > { %v996_v51 = vpop.f32.mrf.mxu0 }
 0x287   : > { %v1759_v52 = vpop.f32.mrf.mxu0 }
 0x289   : > { %v1006_v53 = vpop.f32.mrf.mxu0 }
 0x28b   : > { %v1762_v54 = vpop.f32.mrf.mxu0 }
 0x28d   : > { %v1016_v55 = vpop.f32.mrf.mxu0 }
 0x28f   : > { %v1765_v56 = vpop.f32.mrf.mxu0 }
 0x291   : > { %v1026_v57 = vpop.f32.mrf.mxu0 }
 0x293   : > { %v1768_v60 = vpop.f32.mrf.mxu0 }
 0x295   : > { %v1036_v3 = vpop.f32.mrf.mxu0 }
 0x297   : > { %v1771_v13 = vpop.f32.mrf.mxu0 }
 0x299   : > { %v1046_v23 = vpop.f32.mrf.mxu0 }
 0x29b   : > { %v1774_v33 = vpop.f32.mrf.mxu0 }
 0x29d   : > { %v1056_v44 = vpop.f32.mrf.mxu0 }
 0x2dd   : > { %v1812_v58 = vpop.f32.mrf.mxu1 }
 0x2de   : > { %v1147_v61 = vadd.f32 %v1812_v58, %v1756_v50 }
 0x2df   : > { %v1141_v62 = vpop.f32.mrf.mxu1 }
 0x2e0   : > { %v1228_v0 = vadd.f32 %v2695_v59, %v1147_v61  ;;  %v1142_v1 = vadd.f32 %v1141_v62, %v996_v51 }
 0x2e1   : > { %v1815_v2 = vpop.f32.mrf.mxu1 }
 0x2e2   : > { %v1227_v4 = vadd.f32 %v2695_v59, %v1142_v1  ;;  %v1157_v5 = vadd.f32 %v1815_v2, %v1759_v52  ;;  %v2705_v6 = vsub.f32 %v1228_v0, %v2700_v63 }
 0x2e3   : > { %v1151_v7 = vpop.f32.mrf.mxu1 }
 0x2e4   : > { %v1230_v8 = vadd.f32 %v2695_v59, %v1157_v5  ;;  %v1152_v9 = vadd.f32 %v1151_v7, %v1006_v53  ;;  %v1267_v10 = vmul.f32 %v2705_v6, %v2705_v6  ;;  %v2711_v11 = vsub.f32 %v1227_v4, %v2700_v63 }
 0x2e5   : > { %v1818_v12 = vpop.f32.mrf.mxu1 }
 0x2e6   : > { %v1229_v14 = vadd.f32 %v2695_v59, %v1152_v9  ;;  %v1167_v15 = vadd.f32 %v1818_v12, %v1762_v54  ;;  %1284 = vadd.xlane.f32.xlu1 %v1267_v10  ;;  %v1266_v16 = vmul.f32 %v2711_v11, %v2711_v11  ;;  %v2717_v17 = vsub.f32 %v1230_v8, %v2700_v63  ;;  %v1777_v54 = vpop.f32.mrf.mxu0 }
 0x2e7   : > { %v1161_v18 = vpop.f32.mrf.mxu1 }
 0x2e8   : > { %v1162_v19 = vadd.f32 %v1161_v18, %v1016_v55  ;;  %1282 = vadd.xlane.f32.xlu0 %v1266_v16  ;;  %v1232_v20 = vadd.f32 %v2695_v59, %v1167_v15  ;;  %v2721_v22 = vsub.f32 %v1229_v14, %v2700_v63  ;;  %v1269_v26 = vmul.f32 %v2717_v17, %v2717_v17  ;;  %v1066_v2 = vpop.f32.mrf.mxu0 }
 0x2e9   : > { %v1821_v21 = vpop.f32.mrf.mxu1 }
 0x2ea   : > { %v1231_v24 = vadd.f32 %v2695_v59, %v1162_v19  ;;  %v1177_v25 = vadd.f32 %v1821_v21, %v1765_v56  ;;  %v1268_v31 = vmul.f32 %v2721_v22, %v2721_v22  ;;  %v2732_v32 = vsub.f32 %v1232_v20, %v2700_v63 }
 0x2eb   : > { %v1171_v27 = vpop.f32.mrf.mxu1 }
 0x2ec   : > { %v1172_v28 = vadd.f32 %v1171_v27, %v1026_v57  ;;  %1288 = vadd.xlane.f32.xlu0 %v1269_v26  ;;  %v2727_v29 = vsub.f32 %v1231_v24, %v2700_v63  ;;  %v1234_v34 = vadd.f32 %v2695_v59, %v1177_v25  ;;  %v1271_v43 = vmul.f32 %v2732_v32, %v2732_v32 }
 0x2ed   : > { %v1824_v30 = vpop.f32.mrf.mxu1 }
 0x2ee   : > { %v1233_v35 = vadd.f32 %v2695_v59, %v1172_v28  ;;  %v1187_v36 = vadd.f32 %v1824_v30, %v1768_v60  ;;  %v1270_v37 = vmul.f32 %v2727_v29, %v2727_v29  ;;  %v2748_v48 = vsub.f32 %v1234_v34, %v2700_v63 }
 0x2ef   : > { %v1181_v38 = vpop.f32.mrf.mxu1 }
 0x2f0   : > { %v1182_v39 = vadd.f32 %v1181_v38, %v1036_v3  ;;  %1290 = vadd.xlane.f32.xlu1 %v1270_v37  ;;  %1286 = vadd.xlane.f32.xlu0 %v1268_v31  ;;  %v2739_v40 = vsub.f32 %v1233_v35, %v2700_v63  ;;  %v1236_v41 = vadd.f32 %v2695_v59, %v1187_v36 }
 0x2f1   : > { %v1827_v42 = vpop.f32.mrf.mxu1  ;;  %v1273_v60 = vmul.f32 %v2748_v48, %v2748_v48 }
 0x2f2   : > { %v1235_v45 = vadd.f32 %v2695_v59, %v1182_v39  ;;  %v1197_v46 = vadd.f32 %v1827_v42, %v1771_v13  ;;  %v1272_v47 = vmul.f32 %v2739_v40, %v2739_v40  ;;  %v2755_v55 = vsub.f32 %v1236_v41, %v2700_v63 }
 0x2f3   : > { %v1191_v49 = vpop.f32.mrf.mxu1 }
 0x2f4   : > { %v1192_v50 = vadd.f32 %v1191_v49, %v1046_v23  ;;  %1294 = vadd.xlane.f32.xlu1 %v1272_v47  ;;  %1292 = vadd.xlane.f32.xlu0 %v1271_v43  ;;  %v2751_v51 = vsub.f32 %v1235_v45, %v2700_v63  ;;  %v1238_v52 = vadd.f32 %v2695_v59, %v1197_v46 }
 0x2f5   : > { %v1830_v53 = vpop.f32.mrf.mxu1  ;;  %v1275_v3 = vmul.f32 %v2755_v55, %v2755_v55 }
 0x2f6   : > { %v1237_v56 = vadd.f32 %v2695_v59, %v1192_v50  ;;  %v1207_v57 = vadd.f32 %v1830_v53, %v1774_v33  ;;  %v1274_v58 = vmul.f32 %v2751_v51, %v2751_v51  ;;  %v2768_v4 = vsub.f32 %v1238_v52, %v2700_v63 }
 0x2f7   : > { %v1201_v61 = vpop.f32.mrf.mxu1 }
 0x2f8   : > { %v1202_v62 = vadd.f32 %v1201_v61, %v1056_v44  ;;  %1298 = vadd.xlane.f32.xlu1 %v1274_v58  ;;  %1296 = vadd.xlane.f32.xlu0 %v1273_v60  ;;  %v2763_v0 = vsub.f32 %v1237_v56, %v2700_v63  ;;  %v1240_v5 = vadd.f32 %v2695_v59, %v1207_v57 }
 0x2f9   : > { %v1833_v1 = vpop.f32.mrf.mxu1  ;;  %v1277_v14 = vmul.f32 %v2768_v4, %v2768_v4 }
 0x2fa   : > { %v1239_v7 = vadd.f32 %v2695_v59, %v1202_v62  ;;  %v1217_v8 = vadd.f32 %v1833_v1, %v1777_v54  ;;  %v1276_v9 = vmul.f32 %v2763_v0, %v2763_v0  ;;  %v2784_v19 = vsub.f32 %v1240_v5, %v2700_v63 }
 0x2fb   : > { %v1211_v10 = vpop.f32.mrf.mxu1 }
 0x2fc   : > { %v1212_v12 = vadd.f32 %v1211_v10, %v1066_v2  ;;  %1302 = vadd.xlane.f32.xlu1 %v1276_v9  ;;  %1300 = vadd.xlane.f32.xlu0 %v1275_v3  ;;  %v2775_v13 = vsub.f32 %v1239_v7, %v2700_v63  ;;  %v1242_v15 = vadd.f32 %v2695_v59, %v1217_v8 }
 0x2fd   : > { %v1279_v23 = vmul.f32 %v2784_v19, %v2784_v19 }
 0x2fe   : > { %v1241_v16 = vadd.f32 %v2695_v59, %v1212_v12  ;;  %v1278_v18 = vmul.f32 %v2775_v13, %v2775_v13  ;;  %v2794_v24 = vsub.f32 %v1242_v15, %v2700_v63 }
 0x300   : > { %1306 = vadd.xlane.f32.xlu1 %v1278_v18  ;;  %1304 = vadd.xlane.f32.xlu0 %v1277_v14  ;;  %v2787_v20 = vsub.f32 %v1241_v16, %v2700_v63  ;;  %v1281_v59 = vmul.f32 %v2794_v24, %v2794_v24 }
 0x302   : > { %v1280_v21 = vmul.f32 %v2787_v20, %v2787_v20 }
 0x304   : > { %1310 = vadd.xlane.f32.xlu1 %v1280_v21  ;;  %1308 = vadd.xlane.f32.xlu0 %v1279_v23 }
 0x308   : > { %1312 = vadd.xlane.f32.xlu0 %v1281_v59 }
 0x36f   : > { %v1285_v25 = vpop.xlane.xlu1 %1284 }
 0x370   : > { %v1315_v26 = vadd.f32 1e-06, %v1285_v25 }
 0x371   : > { %v1283_v27 = vpop.xlane.xlu0 %1282 }
 0x372   : > { %2030 = vrsqrt.f32 %v1315_v26  ;;  %v1314_v28 = vadd.f32 1e-06, %v1283_v27 }
 0x374   : > { %2032 = vrsqrt.f32 %v1314_v28 }
 0x375   : > { %v1289_v30 = vpop.xlane.xlu0 %1288 }
 0x376   : > { %v1317_v31 = vadd.f32 1e-06, %v1289_v30 }
 0x378   : > { %2034 = vrsqrt.f32 %v1317_v31 }
 0x379   : > { %v1291_v33 = vpop.xlane.xlu1 %1290  ;;  %v1287_v34 = vpop.xlane.xlu0 %1286 }
 0x37a   : > { %v1318_v35 = vadd.f32 1e-06, %v1291_v33  ;;  %v1316_v63 = vadd.f32 1e-06, %v1287_v34 }
 0x37c   : > { %2036 = vrsqrt.f32 %v1318_v35 }
 0x37d   : > { %2038 = vrsqrt.f32 %v1316_v63  ;;  %v1295_v36 = vpop.xlane.xlu1 %1294  ;;  %v1293_v37 = vpop.xlane.xlu0 %1292 }
 0x37e   : > { %v1320_v38 = vadd.f32 1e-06, %v1295_v36  ;;  %v1319_v39 = vadd.f32 1e-06, %v1293_v37 }
 0x37f   : > { %v2031_v41 = vpop.eup %2030 }
 0x380   : > { %v1347_v42 = vmul.f32 %v2031_v41, %v2705_v6  ;;  %2040 = vrsqrt.f32 %v1320_v38 }
 0x381   : > { %v2033_v43 = vpop.eup %2032  ;;  %2042 = vrsqrt.f32 %v1319_v39  ;;  %v1299_v44 = vpop.xlane.xlu1 %1298 }
 0x382   : > { %v1297_v45 = vpop.xlane.xlu0 %1296  ;;  %v1363_v46 = vmax.f32 %v1347_v42, 0.0  ;;  %v1346_v47 = vmul.f32 %v2033_v43, %v2711_v11  ;;  %v1322_v49 = vadd.f32 1e-06, %v1299_v44 }
 0x383   : > { %v1321_v50 = vadd.f32 1e-06, %v1297_v45 }
 0x384   : > { %1379 = vst [vmem:[%s2640_s0 + $0x8] sm:$0xff] %v1363_v46  ;;  %v1362_v52 = vmax.f32 %v1346_v47, 0.0  ;;  %2044 = vrsqrt.f32 %v1322_v49 }
 0x385   : > { %v2035_v53 = vpop.eup %2034  ;;  %2046 = vrsqrt.f32 %v1321_v50  ;;  %v1303_v54 = vpop.xlane.xlu1 %1302 }
 0x386   : > { %v1301_v56 = vpop.xlane.xlu0 %1300  ;;  %1378 = vst [vmem:[%s2640_s0] sm:$0xff] %v1362_v52  ;;  %v1349_v6 = vmul.f32 %v2035_v53, %v2717_v17  ;;  %v1324_v57 = vadd.f32 1e-06, %v1303_v54 }
 0x387   : > { %v1323_v58 = vadd.f32 1e-06, %v1301_v56 }
 0x388   : > { %v1365_v60 = vmax.f32 %v1349_v6, 0.0  ;;  %2048 = vrsqrt.f32 %v1324_v57 }
 0x389   : > { %v2037_v61 = vpop.eup %2036  ;;  %2050 = vrsqrt.f32 %v1323_v58  ;;  %v1307_v11 = vpop.xlane.xlu1 %1306 }
 0x38a   : > { %v1305_v62 = vpop.xlane.xlu0 %1304  ;;  %v2039_v1 = vpop.eup %2038  ;;  %1381 = vst [vmem:[%s2640_s0 + $0x18] sm:$0xff] %v1365_v60  ;;  %v1350_v2 = vmul.f32 %v2037_v61, %v2727_v29  ;;  %v1326_v3 = vadd.f32 1e-06, %v1307_v11 }
 0x38b   : > { %v1325_v5 = vadd.f32 1e-06, %v1305_v62  ;;  %v1348_v7 = vmul.f32 %v2039_v1, %v2721_v22 }
 0x38c   : > { %v1366_v8 = vmax.f32 %v1350_v2, 0.0  ;;  %2052 = vrsqrt.f32 %v1326_v3 }
 0x38d   : > { %v2041_v17 = vpop.eup %2040  ;;  %v1364_v9 = vmax.f32 %v1348_v7, 0.0  ;;  %2054 = vrsqrt.f32 %v1325_v5  ;;  %v1311_v10 = vpop.xlane.xlu1 %1310 }
 0x38e   : > { %v1309_v12 = vpop.xlane.xlu0 %1308  ;;  %v2043_v14 = vpop.eup %2042  ;;  %1382 = vst [vmem:[%s2640_s0 + $0x20] sm:$0xff] %v1366_v8  ;;  %v1352_v15 = vmul.f32 %v2041_v17, %v2739_v40  ;;  %v1328_v16 = vadd.f32 1e-06, %v1311_v10 }
 0x38f   : > { %v1327_v29 = vadd.f32 1e-06, %v1309_v12  ;;  %1380 = vst [vmem:[%s2640_s0 + $0x10] sm:$0xff] %v1364_v9  ;;  %v1351_v18 = vmul.f32 %v2043_v14, %v2732_v32 }
 0x390   : > { %v1368_v21 = vmax.f32 %v1352_v15, 0.0  ;;  %2056 = vrsqrt.f32 %v1328_v16 }
 0x391   : > { %v2045_v22 = vpop.eup %2044  ;;  %v1367_v23 = vmax.f32 %v1351_v18, 0.0  ;;  %2058 = vrsqrt.f32 %v1327_v29 }
 0x392   : > { %v1313_v59 = vpop.xlane.xlu0 %1312  ;;  %v2047_v25 = vpop.eup %2046  ;;  %1384 = vst [vmem:[%s2640_s0 + $0x30] sm:$0xff] %v1368_v21  ;;  %v1354_v26 = vmul.f32 %v2045_v22, %v2751_v51 }
 0x393   : > { %v1329_v27 = vadd.f32 1e-06, %v1313_v59  ;;  %1383 = vst [vmem:[%s2640_s0 + $0x28] sm:$0xff] %v1367_v23  ;;  %v1353_v40 = vmul.f32 %v2047_v25, %v2748_v48 }
 0x394   : > { %v1370_v28 = vmax.f32 %v1354_v26, 0.0 }
 0x395   : > { %2060 = vrsqrt.f32 %v1329_v27  ;;  %v2049_v32 = vpop.eup %2048  ;;  %v1369_v30 = vmax.f32 %v1353_v40, 0.0 }
 0x396   : > { %v2051_v31 = vpop.eup %2050  ;;  %1386 = vst [vmem:[%s2640_s0 + $0x40] sm:$0xff] %v1370_v28  ;;  %v1356_v33 = vmul.f32 %v2049_v32, %v2763_v0 }
 0x397   : > { %1385 = vst [vmem:[%s2640_s0 + $0x38] sm:$0xff] %v1369_v30  ;;  %v1355_v34 = vmul.f32 %v2051_v31, %v2755_v55 }
 0x398   : > { %v1372_v51 = vmax.f32 %v1356_v33, 0.0 }
 0x399   : > { %v2053_v35 = vpop.eup %2052  ;;  %v1371_v63 = vmax.f32 %v1355_v34, 0.0 }
 0x39a   : > { %v2055_v36 = vpop.eup %2054  ;;  %1388 = vst [vmem:[%s2640_s0 + $0x50] sm:$0xff] %v1372_v51  ;;  %v1358_v48 = vmul.f32 %v2053_v35, %v2775_v13 }
 0x39b   : > { %1387 = vst [vmem:[%s2640_s0 + $0x48] sm:$0xff] %v1371_v63  ;;  %v1357_v37 = vmul.f32 %v2055_v36, %v2768_v4 }
 0x39c   : > { %v1374_v38 = vmax.f32 %v1358_v48, 0.0 }
 0x39d   : > { %v2057_v39 = vpop.eup %2056  ;;  %v1373_v0 = vmax.f32 %v1357_v37, 0.0 }
 0x39e   : > { %v2059_v41 = vpop.eup %2058  ;;  %1390 = vst [vmem:[%s2640_s0 + $0x60] sm:$0xff] %v1374_v38  ;;  %v1360_v55 = vmul.f32 %v2057_v39, %v2787_v20 }
 0x39f   : > { %1389 = vst [vmem:[%s2640_s0 + $0x58] sm:$0xff] %v1373_v0  ;;  %v1359_v42 = vmul.f32 %v2059_v41, %v2784_v19 }
 0x3a0   : > { %v1376_v43 = vmax.f32 %v1360_v55, 0.0 }
 0x3a1   : > { %v1375_v45 = vmax.f32 %v1359_v42, 0.0 }
 0x3a2   : > { %v2061_v44 = vpop.eup %2060  ;;  %1392 = vst [vmem:[%s2640_s0 + $0x70] sm:$0xff] %v1376_v43 }
 0x3a3   : > { %v1361_v13 = vmul.f32 %v2061_v44, %v2794_v24  ;;  %1391 = vst [vmem:[%s2640_s0 + $0x68] sm:$0xff] %v1375_v45 }
 0x3a5   : > { %v1377_v46 = vmax.f32 %v1361_v13, 0.0 }
 0x3a7   : > { %1393 = vst [vmem:[%s2640_s0 + $0x78] sm:$0xff] %v1377_v46 }
 0x3a8 PF: > { %s2989_s4 = sld [smem:[#allocation20_spill]]  ;;  %s1408_s15 = sshll.u32 %s2640_s0, 4  ;;  %s2837_s15 = int_to_ptr.vmem [resolvable:$true] %s1408_s15 }
 0x3a9   : > { %s2991_s25 = sld [smem:[#allocation23_spill]]  ;;  %s2841_s11 = scalar_lea.sflag [#allocation5], %s438_s2 }
 0x3aa   : > { %s2992_s14 = sld [smem:[#allocation34_spill]]  ;;  %s2170_s26 = scalar_lea.vmem %s2837_s15, 2048 }
 0x3ab   : > { %p2171_p1 = scmp.ne.s32.totalorder %s2837_s15, %s2170_s26  ;;  %s2339_s23 = smov [#allocation11]  }
 0x3ac   : > { %s2174_s22 = sshll.u32 %s2339_s23, 4  ;;  %s2175_s22 = int_to_ptr.vmem [resolvable:$false] %s2174_s22 }
 0x3ad   : > { %s2176_s30 = scalar_lea.vmem %s2175_s22, 4096  ;;  %p2177_p6 = scmp.lt.s32.totalorder %s2837_s15, %s2175_s22 }
 0x3ae   : > { %s1609_s24 = sshll.u32 %s2989_s4, 11  ;;  %p2178_p12 = scmp.lt.s32.totalorder %s2176_s30, %s2170_s26 }
 0x3af   : > { %p2994_p5 = scmp.ne.s32.totalorder %s2991_s25, 0 }
 0x3b0   : > { %s2993_s20 = smov %s2992_s14  ;;  %s2834_s3 = scalar_lea.hbm %s2992_s14, %s1609_s24 }
 0x3b1   : > { %p2172_p4 = pnand %p2171_p1, %p2994_p5  ;;  %p2179_p13 = por %p2178_p12, %p2177_p6 }
 0x3b3   : > { %p2173_p0 = pneg %p2172_p4 }
 0x3b5   : > { %p2180_p9 = pnand %p2179_p13, %p2173_p0 }
 0x3b7   : > { %2183 = shalt.err (!%p2180_p9)
}
 0x3b8   : > { %s2184_s2 = scalar_lea.hbm %s2834_s3, 2048  ;;  %s2188_s6 = scalar_lea.hbm %s2993_s20, 6144 }
 0x3b9   : > { %p2185_p2 = scmp.ne.s32.totalorder %s2834_s3, %s2184_s2  ;;  %p2189_p11 = scmp.lt.s32.totalorder %s2834_s3, %s2993_s20 }
 0x3ba   : > { %p2190_p8 = scmp.lt.s32.totalorder %s2188_s6, %s2184_s2 }
 0x3bb   : > { %p2186_p3 = pnand %p2185_p2, %p2994_p5 }
 0x3bc   : > { %p2191_p7 = por %p2190_p8, %p2189_p11 }
 0x3bd   : > { %p2187_p10 = pneg %p2186_p3 }
 0x3bf   : > { %p2192_p1 = pnand %p2191_p7, %p2187_p10 }
 0x3c1   : > { %2195 = shalt.err (!%p2192_p1)
}
 0x3c2   : > { %s2340_s24 = smov 128   ;;  %s2341_s8 = smov 8  }
 0x3c3   : > { %1863 = dma.vmem_to_hbm [thread:$0]  (%p2994_p5), %s2837_s15, 2048, %s2834_s3, %s2841_s11, %s2340_s24, %s2340_s24, %s2341_s8  }
 0x3c4 PF: > { %s2995_s27 = sld [smem:[#allocation17_spill]]  ;;  %p1888_p4 = scmp.ge.s32.totalorder %s2326_s18, 2 }
 0x3c5   : > { %s2996_s14 = sld [smem:[#allocation24_spill]] }
 0x3ca   : > { %s1423_s26 = sand.u32 1, %s2995_s27  }
 0x3cb   : > { %p2997_p0 = scmp.ne.s32.totalorder %s2996_s14, 0  ;;  %s1424_s23 = scalar_lea.sflag [#allocation5], %s1423_s26 }
 0x3cd   : > { %p1880_p6 = pnand %p1888_p4, %p2997_p0 }
 0x3cf   : > { %p1881_p12 = pneg %p1880_p6 }
 0x3d1   : > { %2269 = dma.done.wait (%p1881_p12), %s1424_s23, 2048  }
 0x3d2   : > { %2271 = vsyncadd (%p1881_p12), %s1424_s23, 4294965248  ;;  %s28_s18 = sadd.s32 1, %s2326_s18   ;;  %s2999_s27 = sld [smem:[#allocation18_spill]] }
 0x3d3   : > { %p2869_p13 = scmp.ge.s32.totalorder %s28_s18, 11   ;;  %s3000_s25 = sld [smem:[#allocation25_spill]] }
 0x3d4   : > { %s3001_s3 = sld [smem:[#allocation26_spill]]  ;;  %s3002_s28 = smov %s2282_s29 }
 0x3d5   : > { %s3003_s29 = smov %s2549_s5  ;;  %s3004_s30 = smov %s2290_s9 }
 0x3d6   : > { %s3005_s9 = smov %s2294_s10  ;;  %s3006_s10 = smov %s2579_s21 }
 0x3d7   : > { %s3007_s11 = smov %s2302_s12  ;;  %s3008_s12 = smov %s2306_s13 }
 0x3d8   : > { %s3009_s13 = smov %s2552_s7  ;;  %s3010_s14 = smov %s2318_s16 }
 0x3d9   : > { %s3011_s15 = smov %s2322_s17  ;;  %s3012_s16 = smov %s3000_s25 }
 0x3da   : > { %s3013_s17 = smov %s3001_s3  ;;  %27 = sbr.rel (!%p2869_p13) target bundleno = 22 (0x16), region = 132 }
 0x3df   :  { %1429 = vsyncpa [#allocation4], 1 }
 0x3e0   :  { %1431 = vsyncpa [#allocation4 + $0x1], 1 }
 0x3e1   :  { %1432 = vsyncpa [#allocation7], 1 }
 0x3e2   :  { %1434 = vsyncpa [#allocation7 + $0x1], 1 }
 0x3e3   :  { %1435 = vsyncpa [#allocation10], 1 }
 0x3e4   :  { %1436 = vsyncpa [#allocation5], 1 }
 0x3e5   :  { %1438 = vsyncpa [#allocation5 + $0x1], 1 }

</bundles_post_ra>
